<compile_context>
chip_gen: v7x
topology: tpu7x:2x2x1
jax: 0.10.0
libtpu: 0.0.40
codegen_flags: <defaults>
</compile_context>

<pallas_src>
import math

import jax
import jax.numpy as jnp
import numpy as np
from jax.experimental import pallas as pl
from jax.experimental.pallas import tpu as pltpu


def _make_kernel(S, S_enc, D, H, DK, DFF):
    """Decoder-block kernel body; one grid step == one batch element."""
    BF = jnp.bfloat16
    EPS = 1e-6

    def kernel(x_ref, enc_ref, tb_ref, sb_ref,
               wqkv1, wo1t, wq2t, wkv2, wo2t,
               w1t, b1, w2t, b2,
               a1, c1, a2, c2, a3, c3,
               out_ref):
        x = x_ref[0].astype(jnp.float32)        # [S, D]
        enc = enc_ref[0].astype(jnp.float32)    # [S_enc, D]
        tbias = tb_ref[0].astype(jnp.float32)   # [S, S]      additive mask (0 / -1e30)
        sbias = sb_ref[0].astype(jnp.float32)   # [S, S_enc]

        def ln(v, alpha, bias):
            # Custom torch LayerNormalization: unbiased variance (D-1), (std + eps).
            mean = jnp.mean(v, axis=-1, keepdims=True)
            var = jnp.sum((v - mean) ** 2, axis=-1, keepdims=True) * (1.0 / (D - 1))
            std = jnp.sqrt(var)
            return alpha[...] * (v - mean) / (std + EPS) + bias[...]

        def bdot(act, w_ref):
            # bf16 operands, f32 MXU accumulation.
            return jnp.dot(act.astype(BF), w_ref[...],
                           preferred_element_type=jnp.float32)

        def heads(t, Sq):
            # [Sq, D] -> [H, Sq, DK] via one reshape + transpose (no per-head slices).
            return jnp.transpose(t.reshape(Sq, H, DK), (1, 0, 2)).astype(BF)

        def attend(q, k, v, bias, Sq, Skv):
            # Batched-over-heads attention for one batch element.
            # 1/sqrt(DK) is already folded into the Q projection weights.
            qh, kh, vh = heads(q, Sq), heads(k, Skv), heads(v, Skv)
            s = jnp.einsum("hqd,hkd->hqk", qh, kh,
                           preferred_element_type=jnp.float32)        # [H, Sq, Skv]
            s = s + bias[None, :, :]
            s = s - jnp.max(s, axis=-1, keepdims=True)
            e = jnp.exp(s)
            p = e * pl.reciprocal(jnp.sum(e, axis=-1, keepdims=True), approx=True)
            ctx = jnp.einsum("hqk,hkd->hqd", p.astype(BF), vh,
                             preferred_element_type=jnp.float32)      # [H, Sq, DK]
            return jnp.transpose(ctx, (1, 0, 2)).reshape(Sq, D)       # [Sq, D]

        # ---- Residual 1: self-attention (fused QKV projection) ---------------------
        n1 = ln(x, a1, c1)
        qkv = bdot(n1, wqkv1)                                         # [S, 3D]
        ctx1 = attend(qkv[:, 0:D], qkv[:, D:2 * D], qkv[:, 2 * D:3 * D],
                      tbias, S, S)
        x1 = x + bdot(ctx1, wo1t)

        # ---- Residual 2: cross-attention over encoder output (fused K/V) -----------
        n2 = ln(x1, a2, c2)
        q2 = bdot(n2, wq2t)                                           # [S, D]
        kv2 = bdot(enc, wkv2)                                         # [S_enc, 2D]
        ctx2 = attend(q2, kv2[:, 0:D], kv2[:, D:2 * D], sbias, S, S_enc)
        x2 = x1 + bdot(ctx2, wo2t)

        # ---- Residual 3: FFN: relu -> clamp upper at 100 (lower clamp redundant) ---
        n3 = ln(x2, a3, c3)
        hdd = bdot(n3, w1t) + b1[...]
        hdd = jnp.minimum(jnp.maximum(hdd, 0.0), 100.0)
        out_ref[0] = (x2 + bdot(hdd, w2t) + b2[...]).astype(out_ref.dtype)

    return kernel


def decoder_block_pallas(x, enc, tgt_mask, src_mask, params, h):
    B, S, D = x.shape
    S_enc = enc.shape[1]
    DK = D // h
    DFF = params["w1"].shape[0]
    scale = 1.0 / math.sqrt(DK)
    BF = jnp.bfloat16
    NEG = -1e30

    # ---- Host-side weight plumbing: [out,in] -> [in,out], fuse QKV / KV, fold
    # the attention scale into Wq, cast matmul weights to bf16. -------------------
    wqkv1 = jnp.concatenate([params["wq1"].T * scale, params["wk1"].T,
                             params["wv1"].T], axis=1).astype(BF)      # [D, 3D]
    wo1t = params["wo1"].T.astype(BF)                                  # [D, D]
    wq2t = (params["wq2"].T * scale).astype(BF)                        # [D, D]
    wkv2 = jnp.concatenate([params["wk2"].T, params["wv2"].T], axis=1).astype(BF)
    wo2t = params["wo2"].T.astype(BF)                                  # [D, D]
    w1t = params["w1"].T.astype(BF)                                    # [D, DFF]
    w2t = params["w2"].T.astype(BF)                                    # [DFF, D]
    b1 = params["b1"].astype(jnp.float32).reshape(1, DFF)
    b2 = params["b2"].astype(jnp.float32).reshape(1, D)
    lnp = [params[k].astype(jnp.float32).reshape(1, D)
           for k in ("a1", "c1", "a2", "c2", "a3", "c3")]

    # Activations in bf16 (half the DMA); masks converted to additive biases:
    # torch semantics are attend where mask != 0, -inf where mask == 0 (finite
    # -1e30 here so fully-masked rows give uniform attention instead of NaN).
    x_bf = x.astype(BF)
    enc_bf = enc.astype(BF)
    tbias = jnp.where(tgt_mask != 0, 0.0, NEG).astype(BF)              # [B, S, S]
    sbias = jnp.where(src_mask != 0, 0.0, NEG).astype(BF)              # [B, S, S_enc]

    weights = [wqkv1, wo1t, wq2t, wkv2, wo2t, w1t, b1, w2t, b2] + lnp

    # TODO(synk): for large S, re-tile flash-style over query tiles
    #   (grid=(B, cdiv(S, TQ))) with streamed K/V and an online-softmax VMEM
    #   accumulator; at these sizes one full batch element fits VMEM.
    # TODO(synk): for realistic D/DFF on v7x (64 MiB VMEM) tile the FFN over DFF
    #   (or split it into its own pallas_call) and consider fp8 weight storage.
    in_specs = [
        pl.BlockSpec((1, S, D), lambda b: (b, 0, 0)),          # x
        pl.BlockSpec((1, S_enc, D), lambda b: (b, 0, 0)),      # enc
        pl.BlockSpec((1, S, S), lambda b: (b, 0, 0)),          # tgt mask bias
        pl.BlockSpec((1, S, S_enc), lambda b: (b, 0, 0)),      # src mask bias
    ] + [pl.BlockSpec(w.shape, lambda b: (0, 0)) for w in weights]  # resident weights

    grid_spec = pltpu.PrefetchScalarGridSpec(
        num_scalar_prefetch=0,
        grid=(B,),
        in_specs=in_specs,
        out_specs=pl.BlockSpec((1, S, D), lambda b: (b, 0, 0)),
    )

    kernel = _make_kernel(S, S_enc, D, h, DK, DFF)
    out = pl.pallas_call(
        kernel,
        out_shape=jax.ShapeDtypeStruct((B, S, D), jnp.float32),
        grid_spec=grid_spec,
        compiler_params=pltpu.CompilerParams(
            dimension_semantics=("parallel",),       # shard batch across TCs (v7x)
            vmem_limit_bytes=48 * 1024 * 1024,       # above v5e/v6e defaults, < v7x physical
        ),
    )(x_bf, enc_bf, tbias, sbias, *weights)
    return out


# ----------------------------- pure-JAX f32 reference -----------------------------
def _layer_norm_ref(v, alpha, bias, eps=1e-6):
    mean = jnp.mean(v, axis=-1, keepdims=True)
    var = jnp.sum((v - mean) ** 2, axis=-1, keepdims=True) / (v.shape[-1] - 1)
    std = jnp.sqrt(var)
    return alpha * (v - mean) / (std + eps) + bias


def decoder_block_ref(x, enc, tgt_mask, src_mask, p, h):
    B, S, D = x.shape
    DK = D // h

    def mha(q_in, kv_in, wq, wk, wv, wo, mask):
        Sq, Skv = q_in.shape[1], kv_in.shape[1]
        q = (q_in @ wq.T).reshape(B, Sq, h, DK).transpose(0, 2, 1, 3)
        k = (kv_in @ wk.T).reshape(B, Skv, h, DK).transpose(0, 2, 1, 3)
        v = (kv_in @ wv.T).reshape(B, Skv, h, DK).transpose(0, 2, 1, 3)
        s = jnp.einsum("bhqd,bhkd->bhqk", q, k) / math.sqrt(DK)
        s = jnp.where(mask[:, None] != 0, s, -jnp.inf)   # torch: masked_fill(mask == 0)
        att = jax.nn.softmax(s, axis=-1)
        ctx = jnp.einsum("bhqk,bhkd->bhqd", att, v)
        ctx = ctx.transpose(0, 2, 1, 3).reshape(B, Sq, D)
        return ctx @ wo.T

    n1 = _layer_norm_ref(x, p["a1"], p["c1"])
    x1 = x + mha(n1, n1, p["wq1"], p["wk1"], p["wv1"], p["wo1"], tgt_mask)
    n2 = _layer_norm_ref(x1, p["a2"], p["c2"])
    x2 = x1 + mha(n2, enc, p["wq2"], p["wk2"], p["wv2"], p["wo2"], src_mask)
    n3 = _layer_norm_ref(x2, p["a3"], p["c3"])
    hdn = jnp.clip(jax.nn.relu(n3 @ p["w1"].T + p["b1"]), -100.0, 100.0)
    return x2 + hdn @ p["w2"].T + p["b2"]


if __name__ == "__main__":
    B, S, S_ENC, D, H, DFF = 2, 8, 8, 32, 4, 64

    key = jax.random.PRNGKey(0)
    keys = jax.random.split(key, 16)

    def w(k, shape, scale=0.05):
        return (scale * jax.random.normal(k, shape)).astype(jnp.float32)

    params = {
        "wq1": w(keys[0], (D, D)), "wk1": w(keys[1], (D, D)),
        "wv1": w(keys[2], (D, D)), "wo1": w(keys[3], (D, D)),
        "wq2": w(keys[4], (D, D)), "wk2": w(keys[5], (D, D)),
        "wv2": w(keys[6], (D, D)), "wo2": w(keys[7], (D, D)),
        "w1": w(keys[8], (DFF, D)), "b1": w(keys[9], (1, DFF)),
        "w2": w(keys[10], (D, DFF)), "b2": w(keys[11], (1, D)),
        "a1": jnp.ones((1, D), jnp.float32), "c1": jnp.zeros((1, D), jnp.float32),
        "a2": jnp.ones((1, D), jnp.float32), "c2": jnp.zeros((1, D), jnp.float32),
        "a3": jnp.ones((1, D), jnp.float32), "c3": jnp.zeros((1, D), jnp.float32),
    }

    x = jax.random.normal(keys[12], (B, S, D), dtype=jnp.float32)
    enc = jax.random.normal(keys[13], (B, S_ENC, D), dtype=jnp.float32)
    # Causal mask for self-attention, all-ones mask for cross-attention.
    tgt_mask = jnp.broadcast_to(jnp.tril(jnp.ones((S, S), jnp.float32)), (B, S, S))
    src_mask = jnp.ones((B, S, S_ENC), jnp.float32)

    # TODO(synk): dropout / return_attention_scores / RoPE omitted — eval-mode
    # dropout is identity, the torch SDPA path returns None scores, use_rope=False.
    out = jax.block_until_ready(
        decoder_block_pallas(x, enc, tgt_mask, src_mask, params, H))
    ref = decoder_block_ref(x, enc, tgt_mask, src_mask, params, H)
    # bf16 activations/weights + approx softmax reciprocal -> loosened tolerance.
    np.testing.assert_allclose(np.asarray(out), np.asarray(ref), rtol=3e-2, atol=3e-2)
    print("KERNEL_OK")
</pallas_src>

<mosaic_0001>
module attributes {stable_mosaic.version = 11 : i64} {
  func.func @kernel(%arg0: i32, %arg1: memref<1x8x32xbf16, #tpu.memory_space<vmem>>, %arg2: memref<1x8x32xbf16, #tpu.memory_space<vmem>>, %arg3: memref<1x8x8xbf16, #tpu.memory_space<vmem>>, %arg4: memref<1x8x8xbf16, #tpu.memory_space<vmem>>, %arg5: memref<32x96xbf16, #tpu.memory_space<vmem>>, %arg6: memref<32x32xbf16, #tpu.memory_space<vmem>>, %arg7: memref<32x32xbf16, #tpu.memory_space<vmem>>, %arg8: memref<32x64xbf16, #tpu.memory_space<vmem>>, %arg9: memref<32x32xbf16, #tpu.memory_space<vmem>>, %arg10: memref<32x64xbf16, #tpu.memory_space<vmem>>, %arg11: memref<1x64xf32, #tpu.memory_space<vmem>>, %arg12: memref<64x32xbf16, #tpu.memory_space<vmem>>, %arg13: memref<1x32xf32, #tpu.memory_space<vmem>>, %arg14: memref<1x32xf32, #tpu.memory_space<vmem>>, %arg15: memref<1x32xf32, #tpu.memory_space<vmem>>, %arg16: memref<1x32xf32, #tpu.memory_space<vmem>>, %arg17: memref<1x32xf32, #tpu.memory_space<vmem>>, %arg18: memref<1x32xf32, #tpu.memory_space<vmem>>, %arg19: memref<1x32xf32, #tpu.memory_space<vmem>>, %arg20: memref<1x8x32xf32, #tpu.memory_space<vmem>>) attributes {dimension_semantics = [#tpu.dimension_semantics<parallel>], iteration_bounds = array<i64: 2>, scalar_prefetch = 0 : i64, scratch_operands = 0 : i64, tpu.core_type = #tpu.core_type<tc>, window_params = [{transform_indices = @transform_0, window_bounds = array<i64: 1, 8, 32>}, {transform_indices = @transform_1, window_bounds = array<i64: 1, 8, 32>}, {transform_indices = @transform_2, window_bounds = array<i64: 1, 8, 8>}, {transform_indices = @transform_3, window_bounds = array<i64: 1, 8, 8>}, {pipeline_mode = #tpu.pipeline_mode<synchronous>, transform_indices = @transform_4, window_bounds = array<i64: 32, 96>}, {pipeline_mode = #tpu.pipeline_mode<synchronous>, transform_indices = @transform_5, window_bounds = array<i64: 32, 32>}, {pipeline_mode = #tpu.pipeline_mode<synchronous>, transform_indices = @transform_6, window_bounds = array<i64: 32, 32>}, {pipeline_mode = #tpu.pipeline_mode<synchronous>, transform_indices = @transform_7, window_bounds = array<i64: 32, 64>}, {pipeline_mode = #tpu.pipeline_mode<synchronous>, transform_indices = @transform_8, window_bounds = array<i64: 32, 32>}, {pipeline_mode = #tpu.pipeline_mode<synchronous>, transform_indices = @transform_9, window_bounds = array<i64: 32, 64>}, {pipeline_mode = #tpu.pipeline_mode<synchronous>, transform_indices = @transform_10, window_bounds = array<i64: 1, 64>}, {pipeline_mode = #tpu.pipeline_mode<synchronous>, transform_indices = @transform_11, window_bounds = array<i64: 64, 32>}, {pipeline_mode = #tpu.pipeline_mode<synchronous>, transform_indices = @transform_12, window_bounds = array<i64: 1, 32>}, {pipeline_mode = #tpu.pipeline_mode<synchronous>, transform_indices = @transform_13, window_bounds = array<i64: 1, 32>}, {pipeline_mode = #tpu.pipeline_mode<synchronous>, transform_indices = @transform_14, window_bounds = array<i64: 1, 32>}, {pipeline_mode = #tpu.pipeline_mode<synchronous>, transform_indices = @transform_15, window_bounds = array<i64: 1, 32>}, {pipeline_mode = #tpu.pipeline_mode<synchronous>, transform_indices = @transform_16, window_bounds = array<i64: 1, 32>}, {pipeline_mode = #tpu.pipeline_mode<synchronous>, transform_indices = @transform_17, window_bounds = array<i64: 1, 32>}, {pipeline_mode = #tpu.pipeline_mode<synchronous>, transform_indices = @transform_18, window_bounds = array<i64: 1, 32>}, {transform_indices = @transform_19, window_bounds = array<i64: 1, 8, 32>}]} {
    %c0 = arith.constant 0 : index
    %c0_0 = arith.constant 0 : index
    %c0_1 = arith.constant 0 : index
    %0 = vector.load %arg1[%c0, %c0_0, %c0_1] : memref<1x8x32xbf16, #tpu.memory_space<vmem>>, vector<1x8x32xbf16>
    %1 = vector.shape_cast %0 : vector<1x8x32xbf16> to vector<8x32xbf16>
    %2 = arith.extf %1 : vector<8x32xbf16> to vector<8x32xf32>
    %c0_2 = arith.constant 0 : index
    %c0_3 = arith.constant 0 : index
    %c0_4 = arith.constant 0 : index
    %3 = vector.load %arg2[%c0_2, %c0_3, %c0_4] : memref<1x8x32xbf16, #tpu.memory_space<vmem>>, vector<1x8x32xbf16>
    %4 = vector.shape_cast %3 : vector<1x8x32xbf16> to vector<8x32xbf16>
    %5 = arith.extf %4 : vector<8x32xbf16> to vector<8x32xf32>
    %c0_5 = arith.constant 0 : index
    %c0_6 = arith.constant 0 : index
    %c0_7 = arith.constant 0 : index
    %6 = vector.load %arg3[%c0_5, %c0_6, %c0_7] : memref<1x8x8xbf16, #tpu.memory_space<vmem>>, vector<1x8x8xbf16>
    %7 = vector.shape_cast %6 : vector<1x8x8xbf16> to vector<8x8xbf16>
    %8 = arith.extf %7 : vector<8x8xbf16> to vector<8x8xf32>
    %c0_8 = arith.constant 0 : index
    %c0_9 = arith.constant 0 : index
    %c0_10 = arith.constant 0 : index
    %9 = vector.load %arg4[%c0_8, %c0_9, %c0_10] : memref<1x8x8xbf16, #tpu.memory_space<vmem>>, vector<1x8x8xbf16>
    %10 = vector.shape_cast %9 : vector<1x8x8xbf16> to vector<8x8xbf16>
    %11 = arith.extf %10 : vector<8x8xbf16> to vector<8x8xf32>
    %cst = arith.constant dense<0.000000e+00> : vector<8xf32>
    %12 = vector.multi_reduction <add>, %2, %cst [1] : vector<8x32xf32> to vector<8xf32>
    %13 = vector.shape_cast %12 : vector<8xf32> to vector<8x1xf32>
    %cst_11 = arith.constant 3.200000e+01 : f32
    %14 = vector.broadcast %cst_11 : f32 to vector<8x1xf32>
    %15 = arith.divf %13, %14 : vector<8x1xf32>
    %16 = vector.broadcast %15 : vector<8x1xf32> to vector<8x32xf32>
    %17 = arith.subf %2, %16 : vector<8x32xf32>
    %18 = arith.mulf %17, %17 : vector<8x32xf32>
    %cst_12 = arith.constant dense<0.000000e+00> : vector<8xf32>
    %19 = vector.multi_reduction <add>, %18, %cst_12 [1] : vector<8x32xf32> to vector<8xf32>
    %20 = vector.shape_cast %19 : vector<8xf32> to vector<8x1xf32>
    %cst_13 = arith.constant 0.0322580636 : f32
    %21 = vector.broadcast %cst_13 : f32 to vector<8x1xf32>
    %22 = arith.mulf %20, %21 : vector<8x1xf32>
    %23 = math.sqrt %22 : vector<8x1xf32>
    %c0_14 = arith.constant 0 : index
    %c0_15 = arith.constant 0 : index
    %24 = vector.load %arg14[%c0_14, %c0_15] : memref<1x32xf32, #tpu.memory_space<vmem>>, vector<1x32xf32>
    %25 = vector.broadcast %15 : vector<8x1xf32> to vector<8x32xf32>
    %26 = arith.subf %2, %25 : vector<8x32xf32>
    %27 = vector.broadcast %24 : vector<1x32xf32> to vector<8x32xf32>
    %28 = arith.mulf %27, %26 : vector<8x32xf32>
    %cst_16 = arith.constant 9.99999997E-7 : f32
    %29 = vector.broadcast %cst_16 : f32 to vector<8x1xf32>
    %30 = arith.addf %23, %29 : vector<8x1xf32>
    %31 = vector.broadcast %30 : vector<8x1xf32> to vector<8x32xf32>
    %32 = arith.divf %28, %31 : vector<8x32xf32>
    %c0_17 = arith.constant 0 : index
    %c0_18 = arith.constant 0 : index
    %33 = vector.load %arg15[%c0_17, %c0_18] : memref<1x32xf32, #tpu.memory_space<vmem>>, vector<1x32xf32>
    %34 = vector.broadcast %33 : vector<1x32xf32> to vector<8x32xf32>
    %35 = arith.addf %32, %34 : vector<8x32xf32>
    %36 = arith.truncf %35 : vector<8x32xf32> to vector<8x32xbf16>
    %c0_19 = arith.constant 0 : index
    %c0_20 = arith.constant 0 : index
    %37 = vector.load %arg5[%c0_19, %c0_20] : memref<32x96xbf16, #tpu.memory_space<vmem>>, vector<32x96xbf16>
    %cst_21 = arith.constant dense<0.000000e+00> : vector<8x96xf32>
    %38 = tpu.matmul %36, %37, %cst_21 {dimension_numbers = #tpu.dot_dimension_numbers<[1], [0], [0], [1], [0, 0, 1, 1], [], []>} : vector<8x32xbf16>, vector<32x96xbf16>, vector<8x96xf32> -> vector<8x96xf32>
    %39 = vector.extract_strided_slice %38 {offsets = [0, 0], sizes = [8, 32], strides = [1, 1]} : vector<8x96xf32> to vector<8x32xf32>
    %40 = vector.extract_strided_slice %38 {offsets = [0, 32], sizes = [8, 32], strides = [1, 1]} : vector<8x96xf32> to vector<8x32xf32>
    %41 = vector.extract_strided_slice %38 {offsets = [0, 64], sizes = [8, 32], strides = [1, 1]} : vector<8x96xf32> to vector<8x32xf32>
    %42 = vector.shape_cast %39 : vector<8x32xf32> to vector<8x4x8xf32>
    %43 = tpu.transpose %42, [1, 0, 2] : vector<8x4x8xf32> -> vector<4x8x8xf32>
    %44 = arith.truncf %43 : vector<4x8x8xf32> to vector<4x8x8xbf16>
    %45 = vector.shape_cast %40 : vector<8x32xf32> to vector<8x4x8xf32>
    %46 = tpu.transpose %45, [1, 0, 2] : vector<8x4x8xf32> -> vector<4x8x8xf32>
    %47 = arith.truncf %46 : vector<4x8x8xf32> to vector<4x8x8xbf16>
    %48 = vector.shape_cast %41 : vector<8x32xf32> to vector<8x4x8xf32>
    %49 = tpu.transpose %48, [1, 0, 2] : vector<8x4x8xf32> -> vector<4x8x8xf32>
    %50 = arith.truncf %49 : vector<4x8x8xf32> to vector<4x8x8xbf16>
    "tpu.trace_start"() <{level = 10 : i32, message = "hqd,hkd->hqk"}> : () -> ()
    %cst_22 = arith.constant dense<0.000000e+00> : vector<4x8x8xf32>
    %51 = tpu.matmul %44, %47, %cst_22 {dimension_numbers = #tpu.dot_dimension_numbers<[2], [2], [1], [1], [0, 0, 0, 1, 1, 1], [0], [0]>} : vector<4x8x8xbf16>, vector<4x8x8xbf16>, vector<4x8x8xf32> -> vector<4x8x8xf32>
    "tpu.trace_stop"() : () -> ()
    %52 = vector.shape_cast %8 : vector<8x8xf32> to vector<1x8x8xf32>
    %53 = vector.broadcast %52 : vector<1x8x8xf32> to vector<4x8x8xf32>
    %54 = arith.addf %51, %53 : vector<4x8x8xf32>
    %cst_23 = arith.constant dense<0xFF800000> : vector<4x8xf32>
    %55 = vector.multi_reduction <maximumf>, %54, %cst_23 [2] : vector<4x8x8xf32> to vector<4x8xf32>
    %56 = vector.shape_cast %55 : vector<4x8xf32> to vector<4x8x1xf32>
    %57 = vector.broadcast %56 : vector<4x8x1xf32> to vector<4x8x8xf32>
    %58 = arith.subf %54, %57 : vector<4x8x8xf32>
    %59 = math.exp %58 : vector<4x8x8xf32>
    %cst_24 = arith.constant dense<0.000000e+00> : vector<4x8xf32>
    %60 = vector.multi_reduction <add>, %59, %cst_24 [2] : vector<4x8x8xf32> to vector<4x8xf32>
    %61 = vector.shape_cast %60 : vector<4x8xf32> to vector<4x8x1xf32>
    %62 = tpu.reciprocal %61 {approx = true} : vector<4x8x1xf32> -> vector<4x8x1xf32>
    %63 = vector.broadcast %62 : vector<4x8x1xf32> to vector<4x8x8xf32>
    %64 = arith.mulf %59, %63 : vector<4x8x8xf32>
    %65 = arith.truncf %64 : vector<4x8x8xf32> to vector<4x8x8xbf16>
    "tpu.trace_start"() <{level = 10 : i32, message = "hqk,hkd->hqd"}> : () -> ()
    %cst_25 = arith.constant dense<0.000000e+00> : vector<4x8x8xf32>
    %66 = tpu.matmul %65, %50, %cst_25 {dimension_numbers = #tpu.dot_dimension_numbers<[2], [1], [1], [2], [0, 0, 0, 1, 1, 2], [0], [0]>} : vector<4x8x8xbf16>, vector<4x8x8xbf16>, vector<4x8x8xf32> -> vector<4x8x8xf32>
    "tpu.trace_stop"() : () -> ()
    %67 = tpu.transpose %66, [1, 0, 2] : vector<4x8x8xf32> -> vector<8x4x8xf32>
    %68 = vector.shape_cast %67 : vector<8x4x8xf32> to vector<8x32xf32>
    %69 = arith.truncf %68 : vector<8x32xf32> to vector<8x32xbf16>
    %c0_26 = arith.constant 0 : index
    %c0_27 = arith.constant 0 : index
    %70 = vector.load %arg6[%c0_26, %c0_27] : memref<32x32xbf16, #tpu.memory_space<vmem>>, vector<32x32xbf16>
    %cst_28 = arith.constant dense<0.000000e+00> : vector<8x32xf32>
    %71 = tpu.matmul %69, %70, %cst_28 {dimension_numbers = #tpu.dot_dimension_numbers<[1], [0], [0], [1], [0, 0, 1, 1], [], []>} : vector<8x32xbf16>, vector<32x32xbf16>, vector<8x32xf32> -> vector<8x32xf32>
    %72 = arith.addf %2, %71 : vector<8x32xf32>
    %cst_29 = arith.constant dense<0.000000e+00> : vector<8xf32>
    %73 = vector.multi_reduction <add>, %72, %cst_29 [1] : vector<8x32xf32> to vector<8xf32>
    %74 = vector.shape_cast %73 : vector<8xf32> to vector<8x1xf32>
    %cst_30 = arith.constant 3.200000e+01 : f32
    %75 = vector.broadcast %cst_30 : f32 to vector<8x1xf32>
    %76 = arith.divf %74, %75 : vector<8x1xf32>
    %77 = vector.broadcast %76 : vector<8x1xf32> to vector<8x32xf32>
    %78 = arith.subf %72, %77 : vector<8x32xf32>
    %79 = arith.mulf %78, %78 : vector<8x32xf32>
    %cst_31 = arith.constant dense<0.000000e+00> : vector<8xf32>
    %80 = vector.multi_reduction <add>, %79, %cst_31 [1] : vector<8x32xf32> to vector<8xf32>
    %81 = vector.shape_cast %80 : vector<8xf32> to vector<8x1xf32>
    %cst_32 = arith.constant 0.0322580636 : f32
    %82 = vector.broadcast %cst_32 : f32 to vector<8x1xf32>
    %83 = arith.mulf %81, %82 : vector<8x1xf32>
    %84 = math.sqrt %83 : vector<8x1xf32>
    %c0_33 = arith.constant 0 : index
    %c0_34 = arith.constant 0 : index
    %85 = vector.load %arg16[%c0_33, %c0_34] : memref<1x32xf32, #tpu.memory_space<vmem>>, vector<1x32xf32>
    %86 = vector.broadcast %76 : vector<8x1xf32> to vector<8x32xf32>
    %87 = arith.subf %72, %86 : vector<8x32xf32>
    %88 = vector.broadcast %85 : vector<1x32xf32> to vector<8x32xf32>
    %89 = arith.mulf %88, %87 : vector<8x32xf32>
    %cst_35 = arith.constant 9.99999997E-7 : f32
    %90 = vector.broadcast %cst_35 : f32 to vector<8x1xf32>
    %91 = arith.addf %84, %90 : vector<8x1xf32>
    %92 = vector.broadcast %91 : vector<8x1xf32> to vector<8x32xf32>
    %93 = arith.divf %89, %92 : vector<8x32xf32>
    %c0_36 = arith.constant 0 : index
    %c0_37 = arith.constant 0 : index
    %94 = vector.load %arg17[%c0_36, %c0_37] : memref<1x32xf32, #tpu.memory_space<vmem>>, vector<1x32xf32>
    %95 = vector.broadcast %94 : vector<1x32xf32> to vector<8x32xf32>
    %96 = arith.addf %93, %95 : vector<8x32xf32>
    %97 = arith.truncf %96 : vector<8x32xf32> to vector<8x32xbf16>
    %c0_38 = arith.constant 0 : index
    %c0_39 = arith.constant 0 : index
    %98 = vector.load %arg7[%c0_38, %c0_39] : memref<32x32xbf16, #tpu.memory_space<vmem>>, vector<32x32xbf16>
    %cst_40 = arith.constant dense<0.000000e+00> : vector<8x32xf32>
    %99 = tpu.matmul %97, %98, %cst_40 {dimension_numbers = #tpu.dot_dimension_numbers<[1], [0], [0], [1], [0, 0, 1, 1], [], []>} : vector<8x32xbf16>, vector<32x32xbf16>, vector<8x32xf32> -> vector<8x32xf32>
    %100 = arith.truncf %5 : vector<8x32xf32> to vector<8x32xbf16>
    %c0_41 = arith.constant 0 : index
    %c0_42 = arith.constant 0 : index
    %101 = vector.load %arg8[%c0_41, %c0_42] : memref<32x64xbf16, #tpu.memory_space<vmem>>, vector<32x64xbf16>
    %cst_43 = arith.constant dense<0.000000e+00> : vector<8x64xf32>
    %102 = tpu.matmul %100, %101, %cst_43 {dimension_numbers = #tpu.dot_dimension_numbers<[1], [0], [0], [1], [0, 0, 1, 1], [], []>} : vector<8x32xbf16>, vector<32x64xbf16>, vector<8x64xf32> -> vector<8x64xf32>
    %103 = vector.extract_strided_slice %102 {offsets = [0, 0], sizes = [8, 32], strides = [1, 1]} : vector<8x64xf32> to vector<8x32xf32>
    %104 = vector.extract_strided_slice %102 {offsets = [0, 32], sizes = [8, 32], strides = [1, 1]} : vector<8x64xf32> to vector<8x32xf32>
    %105 = vector.shape_cast %99 : vector<8x32xf32> to vector<8x4x8xf32>
    %106 = tpu.transpose %105, [1, 0, 2] : vector<8x4x8xf32> -> vector<4x8x8xf32>
    %107 = arith.truncf %106 : vector<4x8x8xf32> to vector<4x8x8xbf16>
    %108 = vector.shape_cast %103 : vector<8x32xf32> to vector<8x4x8xf32>
    %109 = tpu.transpose %108, [1, 0, 2] : vector<8x4x8xf32> -> vector<4x8x8xf32>
    %110 = arith.truncf %109 : vector<4x8x8xf32> to vector<4x8x8xbf16>
    %111 = vector.shape_cast %104 : vector<8x32xf32> to vector<8x4x8xf32>
    %112 = tpu.transpose %111, [1, 0, 2] : vector<8x4x8xf32> -> vector<4x8x8xf32>
    %113 = arith.truncf %112 : vector<4x8x8xf32> to vector<4x8x8xbf16>
    "tpu.trace_start"() <{level = 10 : i32, message = "hqd,hkd->hqk"}> : () -> ()
    %cst_44 = arith.constant dense<0.000000e+00> : vector<4x8x8xf32>
    %114 = tpu.matmul %107, %110, %cst_44 {dimension_numbers = #tpu.dot_dimension_numbers<[2], [2], [1], [1], [0, 0, 0, 1, 1, 1], [0], [0]>} : vector<4x8x8xbf16>, vector<4x8x8xbf16>, vector<4x8x8xf32> -> vector<4x8x8xf32>
    "tpu.trace_stop"() : () -> ()
    %115 = vector.shape_cast %11 : vector<8x8xf32> to vector<1x8x8xf32>
    %116 = vector.broadcast %115 : vector<1x8x8xf32> to vector<4x8x8xf32>
    %117 = arith.addf %114, %116 : vector<4x8x8xf32>
    %cst_45 = arith.constant dense<0xFF800000> : vector<4x8xf32>
    %118 = vector.multi_reduction <maximumf>, %117, %cst_45 [2] : vector<4x8x8xf32> to vector<4x8xf32>
    %119 = vector.shape_cast %118 : vector<4x8xf32> to vector<4x8x1xf32>
    %120 = vector.broadcast %119 : vector<4x8x1xf32> to vector<4x8x8xf32>
    %121 = arith.subf %117, %120 : vector<4x8x8xf32>
    %122 = math.exp %121 : vector<4x8x8xf32>
    %cst_46 = arith.constant dense<0.000000e+00> : vector<4x8xf32>
    %123 = vector.multi_reduction <add>, %122, %cst_46 [2] : vector<4x8x8xf32> to vector<4x8xf32>
    %124 = vector.shape_cast %123 : vector<4x8xf32> to vector<4x8x1xf32>
    %125 = tpu.reciprocal %124 {approx = true} : vector<4x8x1xf32> -> vector<4x8x1xf32>
    %126 = vector.broadcast %125 : vector<4x8x1xf32> to vector<4x8x8xf32>
    %127 = arith.mulf %122, %126 : vector<4x8x8xf32>
    %128 = arith.truncf %127 : vector<4x8x8xf32> to vector<4x8x8xbf16>
    "tpu.trace_start"() <{level = 10 : i32, message = "hqk,hkd->hqd"}> : () -> ()
    %cst_47 = arith.constant dense<0.000000e+00> : vector<4x8x8xf32>
    %129 = tpu.matmul %128, %113, %cst_47 {dimension_numbers = #tpu.dot_dimension_numbers<[2], [1], [1], [2], [0, 0, 0, 1, 1, 2], [0], [0]>} : vector<4x8x8xbf16>, vector<4x8x8xbf16>, vector<4x8x8xf32> -> vector<4x8x8xf32>
    "tpu.trace_stop"() : () -> ()
    %130 = tpu.transpose %129, [1, 0, 2] : vector<4x8x8xf32> -> vector<8x4x8xf32>
    %131 = vector.shape_cast %130 : vector<8x4x8xf32> to vector<8x32xf32>
    %132 = arith.truncf %131 : vector<8x32xf32> to vector<8x32xbf16>
    %c0_48 = arith.constant 0 : index
    %c0_49 = arith.constant 0 : index
    %133 = vector.load %arg9[%c0_48, %c0_49] : memref<32x32xbf16, #tpu.memory_space<vmem>>, vector<32x32xbf16>
    %cst_50 = arith.constant dense<0.000000e+00> : vector<8x32xf32>
    %134 = tpu.matmul %132, %133, %cst_50 {dimension_numbers = #tpu.dot_dimension_numbers<[1], [0], [0], [1], [0, 0, 1, 1], [], []>} : vector<8x32xbf16>, vector<32x32xbf16>, vector<8x32xf32> -> vector<8x32xf32>
    %135 = arith.addf %72, %134 : vector<8x32xf32>
    %cst_51 = arith.constant dense<0.000000e+00> : vector<8xf32>
    %136 = vector.multi_reduction <add>, %135, %cst_51 [1] : vector<8x32xf32> to vector<8xf32>
    %137 = vector.shape_cast %136 : vector<8xf32> to vector<8x1xf32>
    %cst_52 = arith.constant 3.200000e+01 : f32
    %138 = vector.broadcast %cst_52 : f32 to vector<8x1xf32>
    %139 = arith.divf %137, %138 : vector<8x1xf32>
    %140 = vector.broadcast %139 : vector<8x1xf32> to vector<8x32xf32>
    %141 = arith.subf %135, %140 : vector<8x32xf32>
    %142 = arith.mulf %141, %141 : vector<8x32xf32>
    %cst_53 = arith.constant dense<0.000000e+00> : vector<8xf32>
    %143 = vector.multi_reduction <add>, %142, %cst_53 [1] : vector<8x32xf32> to vector<8xf32>
    %144 = vector.shape_cast %143 : vector<8xf32> to vector<8x1xf32>
    %cst_54 = arith.constant 0.0322580636 : f32
    %145 = vector.broadcast %cst_54 : f32 to vector<8x1xf32>
    %146 = arith.mulf %144, %145 : vector<8x1xf32>
    %147 = math.sqrt %146 : vector<8x1xf32>
    %c0_55 = arith.constant 0 : index
    %c0_56 = arith.constant 0 : index
    %148 = vector.load %arg18[%c0_55, %c0_56] : memref<1x32xf32, #tpu.memory_space<vmem>>, vector<1x32xf32>
    %149 = vector.broadcast %139 : vector<8x1xf32> to vector<8x32xf32>
    %150 = arith.subf %135, %149 : vector<8x32xf32>
    %151 = vector.broadcast %148 : vector<1x32xf32> to vector<8x32xf32>
    %152 = arith.mulf %151, %150 : vector<8x32xf32>
    %cst_57 = arith.constant 9.99999997E-7 : f32
    %153 = vector.broadcast %cst_57 : f32 to vector<8x1xf32>
    %154 = arith.addf %147, %153 : vector<8x1xf32>
    %155 = vector.broadcast %154 : vector<8x1xf32> to vector<8x32xf32>
    %156 = arith.divf %152, %155 : vector<8x32xf32>
    %c0_58 = arith.constant 0 : index
    %c0_59 = arith.constant 0 : index
    %157 = vector.load %arg19[%c0_58, %c0_59] : memref<1x32xf32, #tpu.memory_space<vmem>>, vector<1x32xf32>
    %158 = vector.broadcast %157 : vector<1x32xf32> to vector<8x32xf32>
    %159 = arith.addf %156, %158 : vector<8x32xf32>
    %160 = arith.truncf %159 : vector<8x32xf32> to vector<8x32xbf16>
    %c0_60 = arith.constant 0 : index
    %c0_61 = arith.constant 0 : index
    %161 = vector.load %arg10[%c0_60, %c0_61] : memref<32x64xbf16, #tpu.memory_space<vmem>>, vector<32x64xbf16>
    %cst_62 = arith.constant dense<0.000000e+00> : vector<8x64xf32>
    %162 = tpu.matmul %160, %161, %cst_62 {dimension_numbers = #tpu.dot_dimension_numbers<[1], [0], [0], [1], [0, 0, 1, 1], [], []>} : vector<8x32xbf16>, vector<32x64xbf16>, vector<8x64xf32> -> vector<8x64xf32>
    %c0_63 = arith.constant 0 : index
    %c0_64 = arith.constant 0 : index
    %163 = vector.load %arg11[%c0_63, %c0_64] : memref<1x64xf32, #tpu.memory_space<vmem>>, vector<1x64xf32>
    %164 = vector.broadcast %163 : vector<1x64xf32> to vector<8x64xf32>
    %165 = arith.addf %162, %164 : vector<8x64xf32>
    %cst_65 = arith.constant 0.000000e+00 : f32
    %166 = vector.broadcast %cst_65 : f32 to vector<8x64xf32>
    %167 = arith.maximumf %165, %166 : vector<8x64xf32>
    %cst_66 = arith.constant 1.000000e+02 : f32
    %168 = vector.broadcast %cst_66 : f32 to vector<8x64xf32>
    %169 = arith.minimumf %167, %168 : vector<8x64xf32>
    %170 = arith.truncf %169 : vector<8x64xf32> to vector<8x64xbf16>
    %c0_67 = arith.constant 0 : index
    %c0_68 = arith.constant 0 : index
    %171 = vector.load %arg12[%c0_67, %c0_68] : memref<64x32xbf16, #tpu.memory_space<vmem>>, vector<64x32xbf16>
    %cst_69 = arith.constant dense<0.000000e+00> : vector<8x32xf32>
    %172 = tpu.matmul %170, %171, %cst_69 {dimension_numbers = #tpu.dot_dimension_numbers<[1], [0], [0], [1], [0, 0, 1, 1], [], []>} : vector<8x64xbf16>, vector<64x32xbf16>, vector<8x32xf32> -> vector<8x32xf32>
    %173 = arith.addf %135, %172 : vector<8x32xf32>
    %c0_70 = arith.constant 0 : index
    %c0_71 = arith.constant 0 : index
    %174 = vector.load %arg13[%c0_70, %c0_71] : memref<1x32xf32, #tpu.memory_space<vmem>>, vector<1x32xf32>
    %175 = vector.broadcast %174 : vector<1x32xf32> to vector<8x32xf32>
    %176 = arith.addf %173, %175 : vector<8x32xf32>
    %c0_72 = arith.constant 0 : index
    %c0_73 = arith.constant 0 : index
    %c0_74 = arith.constant 0 : index
    %177 = vector.load %arg20[%c0_72, %c0_73, %c0_74] : memref<1x8x32xf32, #tpu.memory_space<vmem>>, vector<1x8x32xf32>
    %178 = vector.shape_cast %177 : vector<1x8x32xf32> to vector<8x32xf32>
    %179 = vector.shape_cast %176 : vector<8x32xf32> to vector<1x8x32xf32>
    tpu.vector_store %arg20[%c0_72, %c0_73, %c0_74], %179 {strides = array<i32>} : memref<1x8x32xf32, #tpu.memory_space<vmem>>, vector<1x8x32xf32>,
    return
  }
  func.func @transform_0(%arg0: i32) -> (i32, i32, i32) {
    %c0_i32 = arith.constant 0 : i32
    %c0_i32_0 = arith.constant 0 : i32
    %c0_i32_1 = arith.constant 0 : i32
    return %arg0, %c0_i32, %c0_i32_0 : i32, i32, i32
  }
  func.func @transform_1(%arg0: i32) -> (i32, i32, i32) {
    %c0_i32 = arith.constant 0 : i32
    %c0_i32_0 = arith.constant 0 : i32
    %c0_i32_1 = arith.constant 0 : i32
    return %arg0, %c0_i32, %c0_i32_0 : i32, i32, i32
  }
  func.func @transform_2(%arg0: i32) -> (i32, i32, i32) {
    %c0_i32 = arith.constant 0 : i32
    %c0_i32_0 = arith.constant 0 : i32
    %c0_i32_1 = arith.constant 0 : i32
    return %arg0, %c0_i32, %c0_i32_0 : i32, i32, i32
  }
  func.func @transform_3(%arg0: i32) -> (i32, i32, i32) {
    %c0_i32 = arith.constant 0 : i32
    %c0_i32_0 = arith.constant 0 : i32
    %c0_i32_1 = arith.constant 0 : i32
    return %arg0, %c0_i32, %c0_i32_0 : i32, i32, i32
  }
  func.func @transform_4(%arg0: i32) -> (i32, i32) {
    %c0_i32 = arith.constant 0 : i32
    %c0_i32_0 = arith.constant 0 : i32
    %c0_i32_1 = arith.constant 0 : i32
    return %c0_i32, %c0_i32_0 : i32, i32
  }
  func.func @transform_5(%arg0: i32) -> (i32, i32) {
    %c0_i32 = arith.constant 0 : i32
    %c0_i32_0 = arith.constant 0 : i32
    %c0_i32_1 = arith.constant 0 : i32
    return %c0_i32, %c0_i32_0 : i32, i32
  }
  func.func @transform_6(%arg0: i32) -> (i32, i32) {
    %c0_i32 = arith.constant 0 : i32
    %c0_i32_0 = arith.constant 0 : i32
    %c0_i32_1 = arith.constant 0 : i32
    return %c0_i32, %c0_i32_0 : i32, i32
  }
  func.func @transform_7(%arg0: i32) -> (i32, i32) {
    %c0_i32 = arith.constant 0 : i32
    %c0_i32_0 = arith.constant 0 : i32
    %c0_i32_1 = arith.constant 0 : i32
    return %c0_i32, %c0_i32_0 : i32, i32
  }
  func.func @transform_8(%arg0: i32) -> (i32, i32) {
    %c0_i32 = arith.constant 0 : i32
    %c0_i32_0 = arith.constant 0 : i32
    %c0_i32_1 = arith.constant 0 : i32
    return %c0_i32, %c0_i32_0 : i32, i32
  }
  func.func @transform_9(%arg0: i32) -> (i32, i32) {
    %c0_i32 = arith.constant 0 : i32
    %c0_i32_0 = arith.constant 0 : i32
    %c0_i32_1 = arith.constant 0 : i32
    return %c0_i32, %c0_i32_0 : i32, i32
  }
  func.func @transform_10(%arg0: i32) -> (i32, i32) {
    %c0_i32 = arith.constant 0 : i32
    %c0_i32_0 = arith.constant 0 : i32
    %c0_i32_1 = arith.constant 0 : i32
    return %c0_i32, %c0_i32_0 : i32, i32
  }
  func.func @transform_11(%arg0: i32) -> (i32, i32) {
    %c0_i32 = arith.constant 0 : i32
    %c0_i32_0 = arith.constant 0 : i32
    %c0_i32_1 = arith.constant 0 : i32
    return %c0_i32, %c0_i32_0 : i32, i32
  }
  func.func @transform_12(%arg0: i32) -> (i32, i32) {
    %c0_i32 = arith.constant 0 : i32
    %c0_i32_0 = arith.constant 0 : i32
    %c0_i32_1 = arith.constant 0 : i32
    return %c0_i32, %c0_i32_0 : i32, i32
  }
  func.func @transform_13(%arg0: i32) -> (i32, i32) {
    %c0_i32 = arith.constant 0 : i32
    %c0_i32_0 = arith.constant 0 : i32
    %c0_i32_1 = arith.constant 0 : i32
    return %c0_i32, %c0_i32_0 : i32, i32
  }
  func.func @transform_14(%arg0: i32) -> (i32, i32) {
    %c0_i32 = arith.constant 0 : i32
    %c0_i32_0 = arith.constant 0 : i32
    %c0_i32_1 = arith.constant 0 : i32
    return %c0_i32, %c0_i32_0 : i32, i32
  }
  func.func @transform_15(%arg0: i32) -> (i32, i32) {
    %c0_i32 = arith.constant 0 : i32
    %c0_i32_0 = arith.constant 0 : i32
    %c0_i32_1 = arith.constant 0 : i32
    return %c0_i32, %c0_i32_0 : i32, i32
  }
  func.func @transform_16(%arg0: i32) -> (i32, i32) {
    %c0_i32 = arith.constant 0 : i32
    %c0_i32_0 = arith.constant 0 : i32
    %c0_i32_1 = arith.constant 0 : i32
    return %c0_i32, %c0_i32_0 : i32, i32
  }
  func.func @transform_17(%arg0: i32) -> (i32, i32) {
    %c0_i32 = arith.constant 0 : i32
    %c0_i32_0 = arith.constant 0 : i32
    %c0_i32_1 = arith.constant 0 : i32
    return %c0_i32, %c0_i32_0 : i32, i32
  }
  func.func @transform_18(%arg0: i32) -> (i32, i32) {
    %c0_i32 = arith.constant 0 : i32
    %c0_i32_0 = arith.constant 0 : i32
    %c0_i32_1 = arith.constant 0 : i32
    return %c0_i32, %c0_i32_0 : i32, i32
  }
  func.func @transform_19(%arg0: i32) -> (i32, i32, i32) {
    %c0_i32 = arith.constant 0 : i32
    %c0_i32_0 = arith.constant 0 : i32
    %c0_i32_1 = arith.constant 0 : i32
    return %arg0, %c0_i32, %c0_i32_0 : i32, i32, i32
  }
}

</mosaic_0001>

<bundles_post_ra>
// kernel: tpu_custom_call.1
= control target key start
LH: loop header
LB: loop body
LE: loop exit
PB: predicated region body
PF: predicated region fallthrough
CT: control target
= control target key end

     0   :  { %s5189_s0 = inlined_call_operand.hbm [shape: bf16[2,8,32], index: 0, kind: input, shape index: {}]   ;;  %s5190_s1 = inlined_call_operand.hbm [shape: bf16[2,8,32], index: 1, kind: input, shape index: {}]   ;;  %s5191_s2 = inlined_call_operand.hbm [shape: bf16[2,8,8], index: 2, kind: input, shape index: {}]   ;;  %s5192_s3 = inlined_call_operand.hbm [shape: bf16[2,8,8], index: 3, kind: input, shape index: {}]   ;;  %s5193_s4 = inlined_call_operand.vmem [shape: bf16[32,96], index: 4, kind: input, shape index: {}]   ;;  %s5194_s5 = inlined_call_operand.vmem [shape: bf16[32,32], index: 5, kind: input, shape index: {}]   ;;  %s5195_s6 = inlined_call_operand.vmem [shape: bf16[32,32], index: 6, kind: input, shape index: {}]   ;;  %s5196_s7 = inlined_call_operand.hbm [shape: bf16[32,64], index: 7, kind: input, shape index: {}]   ;;  %s5197_s8 = inlined_call_operand.hbm [shape: bf16[32,32], index: 8, kind: input, shape index: {}]   ;;  %s5198_s9 = inlined_call_operand.vmem [shape: bf16[32,64], index: 9, kind: input, shape index: {}]   ;;  %s5199_s10 = inlined_call_operand.vmem [shape: f32[1,64], index: 10, kind: input, shape index: {}]   ;;  %s5200_s11 = inlined_call_operand.vmem [shape: bf16[64,32], index: 11, kind: input, shape index: {}]   ;;  %s5201_s12 = inlined_call_operand.vmem [shape: f32[1,32], index: 12, kind: input, shape index: {}]   ;;  %s5202_s13 = inlined_call_operand.vmem [shape: f32[1,32], index: 13, kind: input, shape index: {}]   ;;  %s5203_s14 = inlined_call_operand.vmem [shape: f32[1,32], index: 14, kind: input, shape index: {}]   ;;  %s5204_s15 = inlined_call_operand.vmem [shape: f32[1,32], index: 15, kind: input, shape index: {}]   ;;  %s5205_s16 = inlined_call_operand.vmem [shape: f32[1,32], index: 16, kind: input, shape index: {}]   ;;  %s5206_s17 = inlined_call_operand.vmem [shape: f32[1,32], index: 17, kind: input, shape index: {}]   ;;  %s5207_s18 = inlined_call_operand.vmem [shape: f32[1,32], index: 18, kind: input, shape index: {}]   ;;  %s5208_s19 = inlined_call_operand.hbm [shape: f32[2,8,32], index: 19, kind: output, shape index: {}]  }
   0x1   :  { %5241 = sst [smem:[#allocation25_spill]] %s5189_s0 }
   0x2   :  { %5242 = sst [smem:[#allocation26_spill]] %s5190_s1 }
   0x3   :  { %5243 = sst [smem:[#allocation27_spill]] %s5191_s2 }
   0x4   :  { %5244 = sst [smem:[#allocation28_spill]] %s5192_s3 }
   0x5   :  { %5245 = sst [smem:[#allocation29_spill]] %s5194_s5 }
   0x6   :  { %5246 = sst [smem:[#allocation30_spill]] %s5195_s6 }
   0x7   :  { %5247 = sst [smem:[#allocation31_spill]] %s5196_s7 }
   0x8   :  { %5248 = sst [smem:[#allocation32_spill]] %s5197_s8 }
   0x9   :  { %5249 = sst [smem:[#allocation33_spill]] %s5198_s9 }
   0xa   :  { %5250 = sst [smem:[#allocation34_spill]] %s5199_s10 }
   0xb   :  { %5251 = sst [smem:[#allocation35_spill]] %s5200_s11 }
   0xc   :  { %5252 = sst [smem:[#allocation36_spill]] %s5201_s12 }
   0xd   :  { %5253 = sst [smem:[#allocation37_spill]] %s5204_s15 }
   0xe   :  { %5254 = sst [smem:[#allocation38_spill]] %s5205_s16 }
   0xf   :  { %5255 = sst [smem:[#allocation39_spill]] %s5206_s17 }
  0x10   :  { %5256 = sst [smem:[#allocation40_spill]] %s5207_s18 }
  0x11   :  { %5257 = sst [smem:[#allocation41_spill]] %s5208_s19 }
  0x12   :  { %24 = vsyncpa [#allocation3], 0 }
  0x13   :  { %26 = vsyncpa [#allocation3 + $0x1], 0 }
  0x14   :  { %27 = vsyncpa [#allocation6], 0 }
  0x15   :  { %29 = vsyncpa [#allocation6 + $0x1], 0 }
  0x16   :  { %30 = vsyncpa [#allocation9], 0 }
  0x17   :  { %32 = vsyncpa [#allocation9 + $0x1], 0 }
  0x18   :  { %33 = vsyncpa [#allocation12], 0 }
  0x19   :  { %34 = vsyncpa [#allocation4], 0 }
  0x1a   :  { %36 = vsyncpa [#allocation4 + $0x1], 0  ;;  %s4379_s0 = smov 0   ;;  %s4381_s30 = smov 0  }
  0x1b   :  { %s4383_s20 = smov 0   ;;  %s4385_s21 = smov 0  }
  0x1c LB: > { %5258 = sst [smem:[#allocation20_spill]] %s4244_s0  ;;  %s4400_s1 = sadd.s32 4294967295, %s4256_s21   ;;  %s4256_s21 = sphi %s4385_s21, %s5311_s21   ;;  %s4252_s20 = sphi %s4383_s20, %s5315_s20   ;;  %s4248_s30 = sphi %s4381_s30, %s5314_s30   ;;  %s4244_s0 = sphi %s4379_s0, %s5313_s0  }
  0x1d   : > { %s3543_s22 = sadd.s32 4294967294, %s4256_s21   ;;  %p62_p0 = scmp.ne.s32.totalorder %s4248_s30, %s4244_s0 }
  0x1e   : > { %p5216_p1 = scmp.eq.s32.totalorder %s4400_s1, 0  ;;  %p485_p3 = scmp.eq.s32.totalorder %s3543_s22, 1 }
  0x1f   : > { %p3544_p5 = scmp.ge.s32.totalorder %s4256_s21, 1  ;;  %p492_p7 = scmp.lt.s32.totalorder %s4256_s21, 3 }
  0x20   : > { %p4409_p4 = por %p5216_p1, %p62_p0  ;;  %p4414_p6 = por %p485_p3, %p62_p0 }
  0x21   : > { %p4419_p8 = pnand %p3544_p5, %p492_p7  ;;  %s4258_s25 = smov [#allocation10]  }
  0x22   : > { %s5259_s2 = scalar_select %p4409_p4, 1, 0 }
  0x23   : > { %s5260_s23 = scalar_select %p4414_p6, 1, 0 }
  0x24   : > { %s5262_s24 = scalar_select %p4419_p8, 1, 0 }
  0x25   : > { %5261 = sst [smem:[#allocation21_spill]] %s5260_s23  ;;  %s513_s3 = sshll.u32 %s4258_s25, 4  ;;  %s4423_s3 = int_to_ptr.vmem [resolvable:$true] %s513_s3 }
  0x26   : > { %p3860_p9 = pneg %p4419_p8  ;;  %s4435_s27 = sadd.s32 1, %s4256_s21  }
  0x27   : > { %5264 = sst [smem:[#allocation22_spill]] %s4435_s27  ;;  %s49_s28 = sadd.s32 1, %s4252_s20 }
  0x28   : > { %p4430_p11 = pnand %p3860_p9, %p5216_p1  ;;  %s46_s29 = ssub.s32 %s4256_s21, %s4435_s27 }
  0x29   : > { %s5265_s7 = sld [smem:[#allocation31_spill]] }
  0x2a   : > { %s5263_s26 = scalar_select %p4430_p11, 1, 0 }
  0x2b   : > { %p5225_p13 = pneg %p4430_p11 }
  0x2f   : > { %s3998_s25 = scalar_lea.hbm %s5265_s7, 256 }
  0x30   : > { %p3999_p12 = scmp.ne.s32.totalorder %s5265_s7, %s3998_s25  ;;  %p4005_p5 = scmp.lt.u32.totalorder %s3998_s25, %s5265_s7 }
  0x32   : > { %p4001_p0 = pnand %p5225_p13, %p3999_p12 }
  0x34   : > { %p4002_p3 = pneg %p4001_p0 }
  0x36   : > { %p4007_p7 = pnand %p4005_p5, %p4002_p3 }
  0x38   : > { %4010 = shalt.err (!%p4007_p7)
}
  0x39   : > { %s4011_s23 = scalar_lea.vmem %s4423_s3, 256  ;;  %p4019_p2 = scmp.lt.s32.totalorder %s4423_s3, %s4423_s3 }
  0x3a   : > { %p4012_p9 = scmp.ne.s32.totalorder %s4423_s3, %s4011_s23  ;;  %p4020_p12 = scmp.lt.s32.totalorder %s4011_s23, %s4011_s23 }
  0x3c   : > { %p4014_p10 = pnand %p4012_p9, %p5225_p13  ;;  %p4021_p0 = por %p4020_p12, %p4019_p2 }
  0x3e   : > { %p4015_p1 = pneg %p4014_p10 }
  0x40   : > { %p4022_p6 = pnand %p4021_p0, %p4015_p1 }
  0x42   : > { %4025 = shalt.err (!%p4022_p6)
}
  0x43   : > { %s5219_s10 = smov 64   ;;  %s5220_s12 = smov 4  }
  0x44   : > { %3863 = dma.hbm_to_vmem [thread:$0]  (!%p4430_p11), %s5265_s7, 256, %s4423_s3, [#allocation9], %s5219_s10, %s5219_s10, %s5220_s12  }
  0x45   : > { %p47_p1 = scmp.eq.s32.totalorder %s46_s29, 0  ;;  %p56_p2 = scmp.ne.s32.totalorder %s4252_s20, %s4248_s30 }
  0x46   : > { %p57_p6 = scmp.eq.s32.totalorder %s4256_s21, 0  ;;  %p3886_p10 = scmp.lt.s32.totalorder %s4256_s21, 2 }
  0x47   : > { %s4475_s22 = scalar_select %p47_p1, %s4252_s20, %s49_s28  }
  0x48   : > { %p58_p3 = por %p57_p6, %p56_p2  ;;  %p5267_p5 = scmp.eq.s32.totalorder %s4400_s1, 1 }
  0x49   : > { %5266 = sst [smem:[#allocation23_spill]] %s4475_s22  ;;  %s5221_s23 = sand.u32 1, %s4252_s20  }
  0x4a   : > { %p4479_p7 = por %p5267_p5, %p56_p2  ;;  %s4485_s27 = sshll.u32 %s4256_s21, 6 }
  0x4b   : > { %s4489_s19 = sshll.u32 %s5221_s23, 2  ;;  %p4491_p9 = pnand %p3886_p10, %p58_p3 }
  0x4c   : > { %s5268_s25 = scalar_select %p4479_p7, 1, 0 }
  0x4d   : > { %s5270_s3 = scalar_select %p4491_p9, 1, 0 }
  0x4e   : > { %5269 = sst [smem:[#allocation24_spill]] %s5268_s25  ;;  %s5227_s28 = sand.u32 1, %s4256_s21  }
  0x4f   : > { %s5271_s10 = sld [smem:[#allocation26_spill]]  ;;  %s592_s7 = scalar_lea.vmem [#allocation5], %s4489_s19 }
  0x50   : > { %s599_s22 = sshll.u32 %s592_s7, 4  ;;  %s4507_s23 = scalar_lea.sflag [#allocation6], %s5227_s28  ;;  %s4503_s22 = int_to_ptr.vmem [resolvable:$true] %s599_s22 }
  0x51   : > { %p4513_p0 = pneg %p4491_p9 }
  0x53   : > { %s5272_s18 = scalar_select %p4513_p0, 1, 0 }
  0x55   : > { %s4500_s12 = scalar_lea.hbm %s5271_s10, %s4485_s27  ;;  %s4031_s7 = scalar_lea.hbm %s5271_s10, 128 }
  0x56   : > { %s4026_s25 = scalar_lea.hbm %s4500_s12, 64  ;;  %p4032_p6 = scmp.lt.u32.totalorder %s4500_s12, %s5271_s10 }
  0x57   : > { %p4027_p12 = scmp.ne.s32.totalorder %s4500_s12, %s4026_s25  ;;  %p4033_p10 = scmp.lt.u32.totalorder %s4031_s7, %s4026_s25 }
  0x58   : > { %p4035_p5 = scmp.lt.u32.totalorder %s4026_s25, %s4500_s12 }
  0x59   : > { %p4029_p1 = pnand %p4513_p0, %p4027_p12  ;;  %p4034_p3 = por %p4033_p10, %p4032_p6 }
  0x5b   : > { %p4030_p2 = pneg %p4029_p1  ;;  %p4036_p13 = por %p4035_p5, %p4034_p3 }
  0x5d   : > { %p4037_p7 = pnand %p4036_p13, %p4030_p2 }
  0x5f   : > { %4040 = shalt.err (!%p4037_p7)
}
  0x60   : > { %s4041_s28 = scalar_lea.vmem %s4503_s22, 64  ;;  %s4261_s29 = smov [#allocation5]  }
  0x61   : > { %p4042_p12 = scmp.ne.s32.totalorder %s4503_s22, %s4041_s28  ;;  %s4046_s0 = sshll.u32 %s4261_s29, 4  ;;  %s4047_s0 = int_to_ptr.vmem [resolvable:$false] %s4046_s0 }
  0x62   : > { %s4048_s11 = scalar_lea.vmem %s4047_s0, 128  ;;  %p4049_p8 = scmp.lt.s32.totalorder %s4503_s22, %s4047_s0 }
  0x63   : > { %p4044_p1 = pnand %p4042_p12, %p4513_p0  ;;  %p4050_p11 = scmp.lt.s32.totalorder %s4048_s11, %s4041_s28 }
  0x65   : > { %p4045_p4 = pneg %p4044_p1  ;;  %p4051_p6 = por %p4050_p11, %p4049_p8 }
  0x67   : > { %p4052_p10 = pnand %p4051_p6, %p4045_p4 }
  0x69   : > { %4055 = shalt.err (!%p4052_p10)
}
  0x6a   : > { %3873 = dma.hbm_to_vmem [thread:$0]  (!%p4491_p9), %s4500_s12, 64, %s4503_s22, %s4507_s23  }
  0x6b   : > { %s4262_s17 = smov [#allocation11]   ;;  %s5273_s10 = sld [smem:[#allocation25_spill]] }
  0x6c   : > { %s526_s25 = sshll.u32 %s4262_s17, 4  ;;  %s5274_s8 = sld [smem:[#allocation32_spill]]  ;;  %s527_s25 = int_to_ptr.vmem [resolvable:$true] %s526_s25 }
  0x6d   : > { %p5275_p8 = scmp.ne.s32.totalorder %s5263_s26, 0 }
  0x6f   : > { %p5276_p11 = pneg %p5275_p8 }
  0x71   : > { %s4541_s9 = scalar_lea.hbm %s5273_s10, %s4485_s27 }
  0x72   : > { %s4056_s11 = scalar_lea.hbm %s5274_s8, 256 }
  0x73   : > { %p4057_p4 = scmp.ne.s32.totalorder %s5274_s8, %s4056_s11  ;;  %p4063_p2 = scmp.lt.u32.totalorder %s4056_s11, %s5274_s8 }
  0x75   : > { %p4059_p13 = pnand %p4057_p4, %p5276_p11 }
  0x77   : > { %p4060_p7 = pneg %p4059_p13 }
  0x79   : > { %p4065_p3 = pnand %p4063_p2, %p4060_p7 }
  0x7b   : > { %4068 = shalt.err (!%p4065_p3)
}
  0x7c   : > { %s4069_s17 = scalar_lea.vmem %s527_s25, 256  ;;  %p5277_p12 = pmov %p5276_p11 }
  0x7d   : > { %p4070_p5 = scmp.ne.s32.totalorder %s527_s25, %s4069_s17  ;;  %p4077_p10 = scmp.lt.s32.totalorder %s527_s25, %s527_s25 }
  0x7e   : > { %p4078_p9 = scmp.lt.s32.totalorder %s4069_s17, %s4069_s17 }
  0x7f   : > { %p4072_p1 = pnand %p4070_p5, %p5277_p12 }
  0x80   : > { %p4079_p0 = por %p4078_p9, %p4077_p10 }
  0x81   : > { %p4073_p6 = pneg %p4072_p1 }
  0x83   : > { %p4080_p4 = pnand %p4079_p0, %p4073_p6 }
  0x85   : > { %4083 = shalt.err (!%p4080_p4)
}
  0x86   : > { %s5278_s15 = smov 4   ;;  %s5279_s16 = smov 64  }
  0x87   : > { %3866 = dma.hbm_to_vmem [thread:$0]  (!%p5275_p8), %s5274_s8, 256, %s527_s25, [#allocation12], %s5279_s16, %s5279_s16, %s5278_s15  }
  0x88   : > { %s574_s28 = scalar_lea.vmem [#allocation2], %s4489_s19  ;;  %s5280_s12 = sld [smem:[#allocation27_spill]] }
  0x89   : > { %s581_s0 = sshll.u32 %s574_s28, 4  ;;  %s5281_s17 = sand.u32 1, %s4252_s20   ;;  %s4567_s0 = int_to_ptr.vmem [resolvable:$true] %s581_s0 }
  0x8a   : > { %s571_s7 = scalar_lea.sflag [#allocation3], %s5281_s17  ;;  %s4084_s29 = scalar_lea.hbm %s4541_s9, 64 }
  0x8b   : > { %p4085_p9 = scmp.ne.s32.totalorder %s4541_s9, %s4084_s29  ;;  %p5282_p0 = scmp.ne.s32.totalorder %s5272_s18, 0 }
  0x8c   : > { %s4089_s25 = scalar_lea.hbm %s5273_s10, 128  ;;  %p4090_p8 = scmp.lt.u32.totalorder %s4541_s9, %s5273_s10 }
  0x8d   : > { %p4087_p11 = pnand %p4085_p9, %p5282_p0  ;;  %p4091_p7 = scmp.lt.u32.totalorder %s4089_s25, %s4084_s29 }
  0x8e   : > { %s4573_s22 = scalar_lea.hbm %s5280_s12, %s4485_s27  ;;  %p4093_p3 = scmp.lt.u32.totalorder %s4084_s29, %s4541_s9 }
  0x8f   : > { %p4088_p13 = pneg %p4087_p11  ;;  %p4092_p2 = por %p4091_p7, %p4090_p8 }
  0x91   : > { %p4094_p5 = por %p4093_p3, %p4092_p2 }
  0x93   : > { %p4095_p12 = pnand %p4094_p5, %p4088_p13 }
  0x95   : > { %4098 = shalt.err (!%p4095_p12)
}
  0x96   : > { %s4099_s28 = scalar_lea.vmem %s4567_s0, 64  ;;  %s4263_s5 = smov [#allocation2]  }
  0x97   : > { %p4100_p1 = scmp.ne.s32.totalorder %s4567_s0, %s4099_s28  ;;  %s4104_s6 = sshll.u32 %s4263_s5, 4  ;;  %s4105_s6 = int_to_ptr.vmem [resolvable:$false] %s4104_s6 }
  0x98   : > { %s4106_s26 = scalar_lea.vmem %s4105_s6, 128  ;;  %p4107_p4 = scmp.lt.s32.totalorder %s4567_s0, %s4105_s6 }
  0x99   : > { %p4102_p6 = pnand %p4100_p1, %p5282_p0  ;;  %p4108_p9 = scmp.lt.s32.totalorder %s4106_s26, %s4099_s28 }
  0x9b   : > { %p4103_p10 = pneg %p4102_p6  ;;  %p4109_p11 = por %p4108_p9, %p4107_p4 }
  0x9d   : > { %p4110_p8 = pnand %p4109_p11, %p4103_p10 }
  0x9f   : > { %4113 = shalt.err (!%p4110_p8)
}
  0xa0   : > { %p5283_p13 = scmp.ne.s32.totalorder %s5270_s3, 0  ;;  %s610_s11 = scalar_lea.vmem [#allocation7], %s4489_s19 }
  0xa1   : > { %s617_s17 = sshll.u32 %s610_s11, 4  ;;  %s5284_s15 = sld [smem:[#allocation28_spill]]  ;;  %s618_s17 = int_to_ptr.vmem [resolvable:$true] %s617_s17 }
  0xa2   : > { %3870 = dma.hbm_to_vmem [thread:$0]  (!%p5283_p13), %s4541_s9, 64, %s4567_s0, %s571_s7  }
  0xa3   : > { %s4114_s28 = scalar_lea.hbm %s4573_s22, 64  ;;  %s4119_s26 = scalar_lea.hbm %s5280_s12, 128 }
  0xa4   : > { %p4115_p7 = scmp.ne.s32.totalorder %s4573_s22, %s4114_s28  ;;  %p4120_p5 = scmp.lt.u32.totalorder %s4573_s22, %s5280_s12 }
  0xa5   : > { %p4121_p12 = scmp.lt.u32.totalorder %s4119_s26, %s4114_s28  ;;  %p4123_p6 = scmp.lt.u32.totalorder %s4114_s28, %s4573_s22 }
  0xa6   : > { %p4117_p2 = pnand %p4115_p7, %p5282_p0 }
  0xa7   : > { %s4603_s16 = scalar_lea.hbm %s5284_s15, %s4485_s27  ;;  %p4122_p1 = por %p4121_p12, %p4120_p5 }
  0xa8   : > { %p4118_p3 = pneg %p4117_p2 }
  0xa9   : > { %p4124_p10 = por %p4123_p6, %p4122_p1 }
  0xab   : > { %p4125_p4 = pnand %p4124_p10, %p4118_p3 }
  0xad   : > { %4128 = shalt.err (!%p4125_p4)
}
  0xae   : > { %s4129_s9 = scalar_lea.vmem %s618_s17, 64  ;;  %s4264_s27 = smov [#allocation7]  }
  0xaf   : > { %p4130_p9 = scmp.ne.s32.totalorder %s618_s17, %s4129_s9  ;;  %s4134_s0 = sshll.u32 %s4264_s27, 4  ;;  %s4135_s0 = int_to_ptr.vmem [resolvable:$false] %s4134_s0 }
  0xb0   : > { %s4136_s7 = scalar_lea.vmem %s4135_s0, 128  ;;  %p4137_p7 = scmp.lt.s32.totalorder %s618_s17, %s4135_s0 }
  0xb1   : > { %p4132_p11 = pnand %p4130_p9, %p5282_p0  ;;  %p4138_p2 = scmp.lt.s32.totalorder %s4136_s7, %s4129_s9 }
  0xb3   : > { %p4133_p8 = pneg %p4132_p11  ;;  %p4139_p13 = por %p4138_p2, %p4137_p7 }
  0xb5   : > { %p4140_p5 = pnand %p4139_p13, %p4133_p8 }
  0xb7   : > { %4143 = shalt.err (!%p4140_p5)
}
  0xb8   : > { %p5285_p12 = scmp.ne.s32.totalorder %s5270_s3, 0  ;;  %s628_s8 = scalar_lea.vmem [#allocation8], %s4489_s19 }
  0xb9   : > { %s635_s10 = sshll.u32 %s628_s8, 4  ;;  %s5286_s11 = sand.u32 1, %s4256_s21   ;;  %s636_s10 = int_to_ptr.vmem [resolvable:$true] %s635_s10 }
  0xba   : > { %3876 = dma.hbm_to_vmem [thread:$0]  (!%p5285_p12), %s4573_s22, 64, %s618_s17, %s4507_s23  }
  0xbb   : > { %s625_s29 = scalar_lea.sflag [#allocation9], %s5286_s11  ;;  %s4144_s25 = scalar_lea.hbm %s4603_s16, 64 }
  0xbc   : > { %p4145_p13 = scmp.ne.s32.totalorder %s4603_s16, %s4144_s25  ;;  %s4149_s6 = scalar_lea.hbm %s5284_s15, 128 }
  0xbd   : > { %p4150_p6 = scmp.lt.u32.totalorder %s4603_s16, %s5284_s15  ;;  %p4151_p10 = scmp.lt.u32.totalorder %s4149_s6, %s4144_s25 }
  0xbe   : > { %p4147_p3 = pnand %p4145_p13, %p5282_p0  ;;  %p4153_p9 = scmp.lt.u32.totalorder %s4144_s25, %s4603_s16 }
  0xbf   : > { %p4152_p4 = por %p4151_p10, %p4150_p6 }
  0xc0   : > { %p4148_p1 = pneg %p4147_p3 }
  0xc1   : > { %p4154_p11 = por %p4153_p9, %p4152_p4 }
  0xc3   : > { %p4155_p8 = pnand %p4154_p11, %p4148_p1 }
  0xc5   : > { %4158 = shalt.err (!%p4155_p8)
}
  0xc6   : > { %s4159_s23 = scalar_lea.vmem %s636_s10, 64  ;;  %s4265_s19 = smov [#allocation8]  }
  0xc7   : > { %p4160_p7 = scmp.ne.s32.totalorder %s636_s10, %s4159_s23  ;;  %s4164_s22 = sshll.u32 %s4265_s19, 4  ;;  %s4165_s22 = int_to_ptr.vmem [resolvable:$false] %s4164_s22 }
  0xc8   : > { %s4166_s17 = scalar_lea.vmem %s4165_s22, 128  ;;  %p4167_p13 = scmp.lt.s32.totalorder %s636_s10, %s4165_s22 }
  0xc9   : > { %p4162_p2 = pnand %p4160_p7, %p5282_p0  ;;  %p4168_p3 = scmp.lt.s32.totalorder %s4166_s17, %s4159_s23 }
  0xcb   : > { %p4163_p5 = pneg %p4162_p2  ;;  %p4169_p12 = por %p4168_p3, %p4167_p13 }
  0xcd   : > { %p4170_p6 = pnand %p4169_p12, %p4163_p5 }
  0xcf   : > { %4173 = shalt.err (!%p4170_p6)
}
  0xd0   : > { %p5287_p10 = scmp.ne.s32.totalorder %s5270_s3, 0  ;;  %p5288_p1 = scmp.ne.s32.totalorder %s5262_s24, 0 }
  0xd1   : > { %s4646_s18 = sand.u32 (!%p5288_p1), 1, %s4248_s30   ;;  %p5289_p0 = scmp.ne.s32.totalorder (!%p5288_p1), %s5259_s2, 0 }
  0xd2   : > { %3879 = dma.hbm_to_vmem [thread:$0]  (!%p5287_p10), %s4603_s16, 64, %s636_s10, %s625_s29  }
  0xd3   : > { %644 = sbr.rel (%p5288_p1) target bundleno = 4802 (0x12c2), region = 96  ;;  %s4649_s27 = sshll.u32 (!%p5288_p1), %s4646_s18, 2 }
  0xd4   : > { %s647_s0 = scalar_lea.sflag (!%p5288_p1), [#allocation3], %s4646_s18  ;;  %s650_s7 = scalar_lea.vmem (!%p5288_p1), [#allocation2], %s4649_s27 }
  0xda   : > { %4219 = dma.done.wait (%p5289_p0), %s647_s0, 64  }
  0xdb   : > { %4221 = vsyncadd (%p5289_p0), %s647_s0, 4294967232  ;;  %s655_s24 = sand.u32 1, %s4400_s1   ;;  %s659_s16 = scalar_lea.vmem [#allocation5], %s4649_s27 }
  0xdc   : > { %s656_s3 = scalar_lea.sflag [#allocation6], %s655_s24 }
  0xdd   : > { %4223 = dma.done.wait (%p5289_p0), %s656_s3, 128  }
  0xde   : > { %4225 = vsyncadd (%p5289_p0), %s656_s3, 4294967168  ;;  %s668_s8 = scalar_lea.vmem [#allocation7], %s4649_s27  ;;  %s674_s10 = scalar_lea.sflag [#allocation9], %s655_s24 }
  0xdf   : > { %s677_s11 = scalar_lea.vmem [#allocation8], %s4649_s27 }
  0xe0   : > { %4227 = dma.done.wait (%p5289_p0), %s674_s10, 64  }
  0xe1   : > { %4229 = vsyncadd (%p5289_p0), %s674_s10, 4294967232  ;;  %p5290_p12 = scmp.eq.s32.totalorder %s4400_s1, 0 }
  0xe3   : > { %4231 = dma.done.wait (%p5290_p12), [#allocation9], 256   ;;  %p5291_p4 = pmov %p5290_p12 }
  0xe5   : > { %4233 = vsyncadd (%p5291_p4), [#allocation9], 4294967040  ;;  %p5292_p9 = pmov %p5291_p4 }
  0xe6   : > { %p5293_p11 = pmov %p5291_p4 }
  0xe7   : > { %4235 = dma.done.wait (%p5292_p9), [#allocation12], 256  }
  0xe8   : > { %4237 = vsyncadd (%p5293_p11), [#allocation12], 4294967040  ;;  %v756_v0 = vld [vmem:[%s650_s7] sm:$0xf]  ;;  %vm763_vm0 = vcmask 261120   ;;  %v4266_v9 = vmov 0.0   ;;  %v876_v35 = vlaneseq }
  0xe9   : > { %v4677_v1 = vunpack.c.l.bf16 %v756_v0  ;;  %v3938_v8 = vld [vmem:[%s5193_s4] sm:$0xff]   ;;  %3686 = vmatprep.subr.bf16.mxu1 %v4266_v9  ;;  %vm4267_vm1 = vmmov 0   ;;  %v3939_v10 = vld [vmem:[%s5193_s4 + $0x8] sm:$0xff]   ;;  %3700 = vmatprep.subr.bf16.mxu0 %v4266_v9  ;;  %s4268_s23 = smov 104   ;;  %s4269_s19 = smov 120   ;;  %vm1315_vm4 = vcmask 64512  }
  0xea   : > { %3690 = vmatprep.mubr.msk.bf16.mxu1 %vm4267_vm1, %v4266_v9  ;;  %3687 = vmatpush3.bf16.msra.mxu1 %v3938_v8  ;;  %v3564_v19 = vld [vmem:[%s5202_s13] ss:$0 sm:$0xff]  ;;  %s4270_s22 = smov 112   ;;  %s4271_s17 = smov 96   ;;  %v4272_v33 = vmov 1983009808  }
  0xeb   : > { %v764_v2 = vsel %vm763_vm0, %v4677_v1, 0.0  ;;  %3688 = vmatprep.subr.bf16.mxu1 %v4266_v9  ;;  %3702 = vmatprep.mubr.msk.bf16.mxu0 %vm4267_vm1, %v4266_v9  ;;  %v3565_v22 = vld [vmem:[%s5203_s14] ss:$0 sm:$0xff]  ;;  %v874_v34 = vunpack.c.l.s4 %v4272_v33  ;;  %v877_v37 = vshrl.u32 %v876_v35, 7  ;;  %v4273_v39 = vmov 1934713408  }
  0xec   : > { %765 = vadd.xlane.f32.xlu0 %v764_v2  ;;  %v906_v40 = vunpack.c.l.s4 %v4273_v39  ;;  %s4274_s0 = smov 64   ;;  %vm1551_vm5 = vcmask 1043456   ;;  %s5294_s3 = sld [smem:[#allocation29_spill]]  ;;  %vm1882_vm6 = vcmask 130048   ;;  %vm1884_vm7 = vcmask 195584  }
  0xed   : > { %v875_v36 = vunpack.c.0.s8 %v874_v34  ;;  %s4275_s2 = smov 16   ;;  %s4276_s29 = smov 8   ;;  %vm3320_vm12 = vcmask 523264  }
  0xee   : > { %3689 = vmatpush3.bf16.msra.mxu1 %v3939_v10  ;;  %v907_v47 = vunpack.c.0.s8 %v906_v40  ;;  %s4277_s25 = smov 24   ;;  %s5295_s6 = sld [smem:[#allocation30_spill]] }
  0xef   : > { %3694 = vmatprep.subr.bf16.mxu1 %v4266_v9  ;;  %v4732_v43 = vsub.s32 %v875_v36, %v877_v37  ;;  %s5296_s7 = sld [smem:[#allocation37_spill]]  ;;  %s5297_s10 = sld [smem:[#allocation38_spill]] }
  0xf0   : > { %v4742_v53 = vsub.s32 %v907_v47, %v877_v37  ;;  %s5300_s26 = sld [smem:[#allocation39_spill]]  ;;  %s5303_s28 = sld [smem:[#allocation36_spill]] }
  0xf1   : > { %s5304_s5 = sld [smem:[#allocation24_spill]]  ;;  %s5305_s24 = sld [smem:[#allocation41_spill]] }
  0xf2   : > { %s4278_s27 = smov [#allocation13]  }
  0xf7   : > { %p5306_p7 = scmp.ne.s32.totalorder %s5304_s5, 0 }
 0x179   : > { %v766_v3 = vpop.xlane.xlu0 %765 }
 0x17a   : > { %v768_v4 = vmul.f32 0.03125, %v766_v3 }
 0x17c   : > { %v769_v5 = vsub.f32 %v4677_v1, %v768_v4 }
 0x17e   : > { %v770_v6 = vmul.f32 %v769_v5, %v769_v5  ;;  %v789_v20 = vmul.f32 %v3564_v19, %v769_v5 }
 0x180   : > { %v771_v7 = vsel %vm763_vm0, %v770_v6, 0.0 }
 0x181   : > { %772 = vadd.xlane.f32.xlu0 %v771_v7 }
 0x20e   : > { %v773_v11 = vpop.xlane.xlu0 %772 }
 0x20f   : > { %v774_v12 = vmul.f32 0.032258064, %v773_v11 }
 0x211   : > { %3954 = vrsqrt.f32 %v774_v12  ;;  %vm777_vm2 = vcmp.eq.f32.partialorder %v774_v12, inf  ;;  %v780_v15 = vand.u32 2147483648, %v774_v12  ;;  %vm779_vm3 = vcmp.eq.f32.partialorder %v774_v12, 0.0 }
 0x21b   : > { %v3955_v13 = vpop.eup %3954 }
 0x21c   : > { %v776_v14 = vmul.f32 %v3955_v13, %v774_v12 }
 0x21e   : > { %v778_v16 = vsel %vm777_vm2, %v774_v12, %v776_v14 }
 0x21f   : > { %v781_v17 = vsel %vm779_vm3, %v780_v15, %v778_v16 }
 0x220   : > { %v790_v18 = vadd.f32 1e-06, %v781_v17 }
 0x222   : > { %3956 = vrcp.f32 %v790_v18 }
 0x22c   : > { %v3957_v21 = vpop.eup %3956 }
 0x22d   : > { %v792_v23 = vmul.f32 %v3957_v21, %v789_v20 }
 0x22f   : > { %v800_v24 = vadd.f32 %v3565_v22, %v792_v23 }
 0x231   : > { %v801_v25 = vpack.c.bf16 %v800_v24, %v800_v24 }
 0x233   : > { %3691 = vmatmul.mubr.msk.bf16.vlgmr.msra.gmra.mrb[0].mxu1 %vm763_vm0, %v801_v25 }
 0x234   : > { %3696 = vmatprep.mubr.msk.bf16.mxu1 %vm4267_vm1, %v4266_v9 }
 0x306   : > { %v4706_v26 = vpop.f32.mrb[0].mxu1 }
 0x307   : > { %868 = vrot.lane.b32.xlu0 %v4706_v26, %s4268_s23  ;;  %862 = vrot.lane.b32.xlu1 %v4706_v26, %s4269_s19  ;;  %v3692_v27 = vpop.f32.mrb[1].mxu1 }
 0x308   : > { %v858_v28 = vpop.f32.mrb[2].mxu1 }
 0x309   : > { %v3693_v29 = vpop.f32.mrb[3].mxu1 }
 0x30b   : > { %865 = vrot.lane.b32.xlu1 %v4706_v26, %s4270_s22 }
 0x30f   : > { %1011 = vrot.lane.b32.xlu1 %v4706_v26, %s4271_s17 }
 0x379   : > { %v4716_v30 = vpop.permute.xlu1 %862  ;;  %v4724_v32 = vpop.permute.xlu0 %868 }
 0x37a   : > { %1013 = vrot.lane.b32.xlu1 %v4716_v30, %s4271_s17  ;;  %v887_v44 = vcombine.low %v4716_v30, %v4724_v32  ;;  %v888_v45 = vcombine.high %v4716_v30, %v4724_v32 }
 0x37c   : > { %v895_v50 = vrot.slane %v887_v44, %v4732_v43  ;;  %v902_v51 = vrot.slane %v888_v45, %v4732_v43 }
 0x37d   : > { %v4720_v31 = vpop.permute.xlu1 %865 }
 0x37e   : > { %1015 = vrot.lane.b32.xlu1 %v4720_v31, %s4271_s17  ;;  %v871_v41 = vcombine.low %v4706_v26, %v4720_v31  ;;  %v872_v42 = vcombine.high %v4706_v26, %v4720_v31 }
 0x380   : > { %v879_v48 = vrot.slane %v871_v41, %v4732_v43  ;;  %v886_v49 = vrot.slane %v872_v42, %v4732_v43 }
 0x381   : > { %v1012_v38 = vpop.permute.xlu1 %1011 }
 0x382   : > { %1017 = vrot.lane.b32.xlu1 %v4724_v32, %s4271_s17  ;;  %v903_v54 = vcombine.low %v879_v48, %v895_v50  ;;  %v904_v55 = vcombine.high %v879_v48, %v895_v50  ;;  %v919_v56 = vcombine.low %v886_v49, %v902_v51  ;;  %v920_v57 = vcombine.high %v886_v49, %v902_v51 }
 0x384   : > { %v911_v63 = vrot.slane %v903_v54, %v4742_v53  ;;  %v918_v0 = vrot.slane %v904_v55, %v4742_v53  ;;  %v927_v2 = vrot.slane %v919_v56, %v4742_v53  ;;  %v934_v3 = vrot.slane %v920_v57, %v4742_v53 }
 0x386   : > { %v939_v13 = vcombine.low %v911_v63, %v918_v0  ;;  %v3569_v14 = vcombine.high %v911_v63, %v918_v0  ;;  %v955_v15 = vcombine.low %v927_v2, %v934_v3  ;;  %v3570_v16 = vcombine.high %v927_v2, %v934_v3 }
 0x388   : > { %v946_v25 = vrot.slane %v939_v13, %v4732_v43  ;;  %v954_v27 = vrot.slane %v3569_v14, %v4732_v43  ;;  %v962_v28 = vrot.slane %v955_v15, %v4732_v43  ;;  %v970_v29 = vrot.slane %v3570_v16, %v4732_v43  ;;  %v759_v13 = vld [vmem:[%s668_s8] sm:$0xf] }
 0x389   : > { %v760_v14 = vunpack.c.l.bf16 %v759_v13 }
 0x38a   : > { %v971_v44 = vcombine.low %v946_v25, %v954_v27  ;;  %v987_v45 = vcombine.low %v962_v28, %v970_v29 }
 0x38c   : > { %v995_v54 = vrot.slane %v987_v45, %v4742_v53 }
 0x3ec   : > { %v1014_v46 = vpop.permute.xlu1 %1013 }
 0x3f0   : > { %v1016_v52 = vpop.permute.xlu1 %1015 }
 0x3f1   : > { %v1023_v58 = vcombine.low %v1012_v38, %v1016_v52  ;;  %v1024_v59 = vcombine.high %v1012_v38, %v1016_v52  ;;  %v979_v52 = vrot.slane %v971_v44, %v4742_v53 }
 0x3f3   : > { %v1031_v4 = vrot.slane %v1023_v58, %v4732_v43  ;;  %v1038_v5 = vrot.slane %v1024_v59, %v4732_v43  ;;  %v972_v59 = vcombine.high %v946_v25, %v954_v27 }
 0x3f4   : > { %v1018_v60 = vpop.permute.xlu1 %1017 }
 0x3f5   : > { %v1039_v61 = vcombine.low %v1014_v46, %v1018_v60  ;;  %v1040_v62 = vcombine.high %v1014_v46, %v1018_v60  ;;  %v1003_v60 = vcombine.low %v979_v52, %v995_v54 }
 0x3f7   : > { %v1047_v6 = vrot.slane %v1039_v61, %v4732_v43  ;;  %v1054_v7 = vrot.slane %v1040_v62, %v4732_v43  ;;  %v1004_v61 = vcombine.high %v979_v52, %v995_v54  ;;  %v988_v62 = vcombine.high %v962_v28, %v970_v29 }
 0x3f8   : > { %v1007_v2 = vpack.c.bf16 %v1003_v60, %v1003_v60 }
 0x3f9   : > { %v1055_v8 = vcombine.low %v1031_v4, %v1047_v6  ;;  %v1056_v10 = vcombine.high %v1031_v4, %v1047_v6  ;;  %v1071_v11 = vcombine.low %v1038_v5, %v1054_v7  ;;  %v1072_v12 = vcombine.high %v1038_v5, %v1054_v7 }
 0x3fa   : > { %v1008_v3 = vpack.c.bf16 %v1004_v61, %v1004_v61  ;;  %v986_v4 = vrot.slane %v972_v59, %v4742_v53  ;;  %v1002_v5 = vrot.slane %v988_v62, %v4742_v53 }
 0x3fb   : > { %v1063_v17 = vrot.slane %v1055_v8, %v4742_v53  ;;  %v1070_v18 = vrot.slane %v1056_v10, %v4742_v53  ;;  %v1079_v19 = vrot.slane %v1071_v11, %v4742_v53  ;;  %v1086_v20 = vrot.slane %v1072_v12, %v4742_v53 }
 0x3fc   : > { %v1005_v8 = vcombine.low %v986_v4, %v1002_v5  ;;  %v1006_v10 = vcombine.high %v986_v4, %v1002_v5 }
 0x3fd   : > { %v1091_v21 = vcombine.low %v1063_v17, %v1070_v18  ;;  %v3571_v22 = vcombine.high %v1063_v17, %v1070_v18  ;;  %v1107_v23 = vcombine.low %v1079_v19, %v1086_v20  ;;  %v3572_v24 = vcombine.high %v1079_v19, %v1086_v20 }
 0x3fe   : > { %v1009_v11 = vpack.c.bf16 %v1005_v8, %v1005_v8  ;;  %v1010_v12 = vpack.c.bf16 %v1006_v10, %v1006_v10 }
 0x3ff   : > { %v1098_v33 = vrot.slane %v1091_v21, %v4732_v43  ;;  %v1106_v34 = vrot.slane %v3571_v22, %v4732_v43  ;;  %v1114_v35 = vrot.slane %v1107_v23, %v4732_v43  ;;  %v1122_v36 = vrot.slane %v3572_v24, %v4732_v43 }
 0x401   : > { %v1123_v37 = vcombine.low %v1098_v33, %v1106_v34  ;;  %v1139_v38 = vcombine.low %v1114_v35, %v1122_v36  ;;  %v1124_v39 = vcombine.high %v1098_v33, %v1106_v34  ;;  %v1140_v40 = vcombine.high %v1114_v35, %v1122_v36 }
 0x403   : > { %v1131_v41 = vrot.slane %v1123_v37, %v4742_v53  ;;  %v1147_v42 = vrot.slane %v1139_v38, %v4742_v53  ;;  %v1138_v48 = vrot.slane %v1124_v39, %v4742_v53  ;;  %v1154_v49 = vrot.slane %v1140_v40, %v4742_v53 }
 0x405   : > { %v1155_v46 = vcombine.low %v1131_v41, %v1147_v42  ;;  %v1156_v47 = vcombine.high %v1131_v41, %v1147_v42  ;;  %v1157_v57 = vcombine.low %v1138_v48, %v1154_v49  ;;  %v1158_v58 = vcombine.high %v1138_v48, %v1154_v49 }
 0x407   : > { %v1159_v50 = vpack.c.bf16 %v1155_v46, %v1155_v46  ;;  %v1160_v51 = vpack.c.bf16 %v1156_v47, %v1156_v47  ;;  %v1161_v63 = vpack.c.bf16 %v1157_v57, %v1157_v57  ;;  %v1162_v0 = vpack.c.bf16 %v1158_v58, %v1158_v58 }
 0x409   : > { %v1320_v55 = vsel %vm1315_vm4, %v1159_v50, 0  ;;  %v1366_v56 = vsel %vm1315_vm4, %v1160_v51, 0  ;;  %v1412_v6 = vsel %vm1315_vm4, %v1161_v63, 0  ;;  %v1458_v7 = vsel %vm1315_vm4, %v1162_v0, 0 }
 0x40a   : > { %3695 = vmatpush3.bf16.xpose.msra.mxu1 %v1320_v55  ;;  %3701 = vmatpush3.bf16.xpose.msra.mxu0 %v1366_v56 }
 0x40b   : > { %3706 = vmatprep.subr.bf16.mxu1 %v4266_v9  ;;  %3712 = vmatprep.subr.bf16.mxu0 %v4266_v9 }
 0x411   : > { %3697 = vmatmul.mubr.msk.bf16.vlgmr.msra.gmra.mrb[4].mxu1 %vm1315_vm4, %v1007_v2  ;;  %3703 = vmatmul.mubr.msk.bf16.vlgmr.msra.gmra.mrb[0].mxu0 %vm1315_vm4, %v1008_v3 }
 0x412   : > { %3707 = vmatpush3.bf16.xpose.msra.mxu1 %v1412_v6  ;;  %3713 = vmatpush3.bf16.xpose.msra.mxu0 %v1458_v7 }
 0x413   : > { %3708 = vmatprep.mubr.msk.bf16.mxu1 %vm4267_vm1, %v4266_v9  ;;  %3714 = vmatprep.mubr.msk.bf16.mxu0 %vm4267_vm1, %v4266_v9 }
 0x414   : > { %3718 = vmatprep.subr.bf16.mxu1 %v4266_v9  ;;  %3724 = vmatprep.subr.bf16.mxu0 %v4266_v9 }
 0x419   : > { %3709 = vmatmul.mubr.msk.bf16.vlgmr.msra.gmra.mrb[8].mxu1 %vm1315_vm4, %v1009_v11  ;;  %3715 = vmatmul.mubr.msk.bf16.vlgmr.msra.gmra.mrb[4].mxu0 %vm1315_vm4, %v1010_v12 }
 0x41a   : > { %3720 = vmatprep.mubr.msk.bf16.mxu1 %vm4267_vm1, %v4266_v9  ;;  %3726 = vmatprep.mubr.msk.bf16.mxu0 %vm4267_vm1, %v4266_v9 }
 0x4e4   : > { %v1356_v15 = vpop.f32.mrb[4].mxu1  ;;  %v1402_v16 = vpop.f32.mrb[0].mxu0 }
 0x4e5   : > { %v1357_v17 = vadd.f32 %v1356_v15, %v760_v14  ;;  %v1403_v18 = vadd.f32 %v1402_v16, %v760_v14  ;;  %v3698_v19 = vpop.f32.mrb[5].mxu1  ;;  %v3704_v20 = vpop.f32.mrb[1].mxu0 }
 0x4e6   : > { %v1359_v21 = vpop.f32.mrb[6].mxu1  ;;  %v1405_v22 = vpop.f32.mrb[2].mxu0 }
 0x4e7   : > { %v3699_v23 = vpop.f32.mrb[7].mxu1  ;;  %v3705_v24 = vpop.f32.mrb[3].mxu0  ;;  %v1503_v25 = vsel %vm1315_vm4, %v1403_v18, -inf  ;;  %v1500_v27 = vsel %vm1315_vm4, %v1357_v17, -inf }
 0x4e8   : > { %1504 = vmax.xlane.f32.xlu0 %v1503_v25  ;;  %1501 = vmax.xlane.f32.xlu1 %v1500_v27 }
 0x4ec   : > { %v1448_v28 = vpop.f32.mrb[8].mxu1  ;;  %v1494_v29 = vpop.f32.mrb[4].mxu0 }
 0x4ed   : > { %v1449_v33 = vadd.f32 %v1448_v28, %v760_v14  ;;  %v1495_v34 = vadd.f32 %v1494_v29, %v760_v14  ;;  %v3710_v35 = vpop.f32.mrb[9].mxu1  ;;  %v3716_v36 = vpop.f32.mrb[5].mxu0 }
 0x4ee   : > { %v1451_v37 = vpop.f32.mrb[10].mxu1  ;;  %v1497_v38 = vpop.f32.mrb[6].mxu0 }
 0x4ef   : > { %v3711_v39 = vpop.f32.mrb[11].mxu1  ;;  %v3717_v40 = vpop.f32.mrb[7].mxu0  ;;  %v1509_v41 = vsel %vm1315_vm4, %v1495_v34, -inf  ;;  %v1506_v42 = vsel %vm1315_vm4, %v1449_v33, -inf }
 0x4f0   : > { %1510 = vmax.xlane.f32.xlu0 %v1509_v41  ;;  %1507 = vmax.xlane.f32.xlu1 %v1506_v42 }
 0x501   : > { %1163 = vrot.lane.b32.xlu1 %v4706_v26, %s4274_s0 }
 0x575   : > { %v1505_v44 = vpop.xlane.xlu0 %1504  ;;  %v1502_v45 = vpop.xlane.xlu1 %1501 }
 0x576   : > { %v1513_v46 = vsub.f32 %v1403_v18, %v1505_v44  ;;  %v1512_v47 = vsub.f32 %v1357_v17, %v1502_v45 }
 0x578   : > { %v1518_v48 = vmul.f32 1.442695, %v1513_v46  ;;  %v1516_v49 = vmul.f32 1.442695, %v1512_v47 }
 0x57a   : > { %3958 = vpow2.f32 %v1518_v48 }
 0x57b   : > { %3960 = vpow2.f32 %v1516_v49 }
 0x57d   : > { %v1508_v26 = vpop.xlane.xlu1 %1507  ;;  %v1511_v56 = vpop.xlane.xlu0 %1510 }
 0x57e   : > { %v1514_v55 = vsub.f32 %v1449_v33, %v1508_v26  ;;  %v1515_v58 = vsub.f32 %v1495_v34, %v1511_v56 }
 0x580   : > { %v1520_v57 = vmul.f32 1.442695, %v1514_v55  ;;  %v1522_v59 = vmul.f32 1.442695, %v1515_v58 }
 0x582   : > { %3962 = vpow2.f32 %v1520_v57 }
 0x583   : > { %3964 = vpow2.f32 %v1522_v59 }
 0x584   : > { %v4799_v50 = vpop.eup %3958 }
 0x585   : > { %v4801_v51 = vpop.eup %3960  ;;  %v1527_v52 = vsel %vm1315_vm4, %v4799_v50, 0.0 }
 0x586   : > { %1528 = vadd.xlane.f32.xlu0 %v1527_v52  ;;  %v1524_v54 = vsel %vm1315_vm4, %v4801_v51, 0.0 }
 0x587   : > { %1525 = vadd.xlane.f32.xlu1 %v1524_v54 }
 0x58c   : > { %v4810_v60 = vpop.eup %3962 }
 0x58d   : > { %v1530_v61 = vsel %vm1315_vm4, %v4810_v60, 0.0  ;;  %v4814_v62 = vpop.eup %3964 }
 0x598   : > { %1167 = vrot.lane.b32.xlu1 %v4720_v31, %s4274_s0  ;;  %v1533_v31 = vsel %vm1315_vm4, %v4814_v62, 0.0 }
 0x59c   : > { %1169 = vrot.lane.b32.xlu1 %v4724_v32, %s4274_s0  ;;  %1165 = vrot.lane.b32.xlu0 %v4716_v30, %s4274_s0  ;;  %v1164_v30 = vpop.permute.xlu1 %1163 }
 0x5bb   : > { %1531 = vadd.xlane.f32.xlu0 %v1530_v61 }
 0x5c0   : > { %1534 = vadd.xlane.f32.xlu1 %v1533_v31 }
 0x613   : > { %v1529_v63 = vpop.xlane.xlu0 %1528 }
 0x614   : > { %v1526_v32 = vpop.xlane.xlu1 %1525  ;;  %3966 = vrcp.f32 %v1529_v63 }
 0x615   : > { %3968 = vrcp.f32 %v1526_v32 }
 0x617   : > { %v1166_v4 = vpop.permute.xlu0 %1165 }
 0x618   : > { %v1168_v0 = vpop.permute.xlu1 %1167 }
 0x619   : > { %v1175_v2 = vcombine.low %v1164_v30, %v1168_v0  ;;  %v1176_v3 = vcombine.high %v1164_v30, %v1168_v0 }
 0x61b   : > { %v1183_v8 = vrot.slane %v1175_v2, %v4732_v43  ;;  %v1190_v10 = vrot.slane %v1176_v3, %v4732_v43 }
 0x61c   : > { %v1170_v5 = vpop.permute.xlu1 %1169 }
 0x61d   : > { %v1191_v6 = vcombine.low %v1166_v4, %v1170_v5  ;;  %v1192_v7 = vcombine.high %v1166_v4, %v1170_v5 }
 0x61e   : > { %v3967_v37 = vpop.eup %3966 }
 0x61f   : > { %v1199_v11 = vrot.slane %v1191_v6, %v4732_v43  ;;  %v1206_v12 = vrot.slane %v1192_v7, %v4732_v43  ;;  %v3969_v42 = vpop.eup %3968  ;;  %v1541_v48 = vmul.f32 %v3967_v37, %v4799_v50 }
 0x620   : > { %v1540_v49 = vmul.f32 %v3969_v42, %v4801_v51 }
 0x621   : > { %v1207_v13 = vcombine.low %v1183_v8, %v1199_v11  ;;  %v1208_v14 = vcombine.high %v1183_v8, %v1199_v11  ;;  %v1223_v15 = vcombine.low %v1190_v10, %v1206_v12  ;;  %v1224_v16 = vcombine.high %v1190_v10, %v1206_v12 }
 0x622   : > { %v1544_v58 = vpack.c.bf16 %v1540_v49, %v1540_v49  ;;  %v1545_v59 = vpack.c.bf16 %v1541_v48, %v1541_v48 }
 0x623   : > { %v1215_v17 = vrot.slane %v1207_v13, %v4742_v53  ;;  %v1222_v18 = vrot.slane %v1208_v14, %v4742_v53  ;;  %v1231_v19 = vrot.slane %v1223_v15, %v4742_v53  ;;  %v1238_v20 = vrot.slane %v1224_v16, %v4742_v53 }
 0x625   : > { %v1243_v21 = vcombine.low %v1215_v17, %v1222_v18  ;;  %v3573_v22 = vcombine.high %v1215_v17, %v1222_v18  ;;  %v1259_v23 = vcombine.low %v1231_v19, %v1238_v20  ;;  %v3574_v24 = vcombine.high %v1231_v19, %v1238_v20 }
 0x627   : > { %v1250_v25 = vrot.slane %v1243_v21, %v4732_v43  ;;  %v1258_v27 = vrot.slane %v3573_v22, %v4732_v43  ;;  %v1266_v28 = vrot.slane %v1259_v23, %v4732_v43  ;;  %v1274_v29 = vrot.slane %v3574_v24, %v4732_v43 }
 0x629   : > { %v1275_v33 = vcombine.low %v1250_v25, %v1258_v27  ;;  %v1291_v34 = vcombine.low %v1266_v28, %v1274_v29  ;;  %v1276_v35 = vcombine.high %v1250_v25, %v1258_v27  ;;  %v1292_v36 = vcombine.high %v1266_v28, %v1274_v29  ;;  %v3940_v28 = vld [vmem:[%s5294_s3] sm:$0xff]  }
 0x62b   : > { %v1283_v38 = vrot.slane %v1275_v33, %v4742_v53  ;;  %v1299_v39 = vrot.slane %v1291_v34, %v4742_v53  ;;  %v1290_v40 = vrot.slane %v1276_v35, %v4742_v53  ;;  %v1306_v41 = vrot.slane %v1292_v36, %v4742_v53 }
 0x62d   : > { %v1307_v44 = vcombine.low %v1283_v38, %v1299_v39  ;;  %v1308_v45 = vcombine.high %v1283_v38, %v1299_v39  ;;  %v1309_v46 = vcombine.low %v1290_v40, %v1306_v41  ;;  %v1310_v47 = vcombine.high %v1290_v40, %v1306_v41  ;;  %v3941_v40 = vld [vmem:[%s5294_s3 + $0x8] sm:$0xff]  }
 0x62f   : > { %v1311_v52 = vpack.c.bf16 %v1307_v44, %v1307_v44  ;;  %v1312_v54 = vpack.c.bf16 %v1308_v45, %v1308_v45  ;;  %v1313_v56 = vpack.c.bf16 %v1309_v46, %v1309_v46  ;;  %v1314_v57 = vpack.c.bf16 %v1310_v47, %v1310_v47 }
 0x631   : > { %v1553_v26 = vsel %vm1551_vm5, %v1311_v52, 0  ;;  %v1599_v55 = vsel %vm1551_vm5, %v1312_v54, 0  ;;  %v1645_v50 = vsel %vm1551_vm5, %v1313_v56, 0  ;;  %v1691_v51 = vsel %vm1551_vm5, %v1314_v57, 0 }
 0x632   : > { %3719 = vmatpush3.bf16.msra.mxu1 %v1553_v26  ;;  %3725 = vmatpush3.bf16.msra.mxu0 %v1599_v55 }
 0x633   : > { %3730 = vmatprep.subr.bf16.mxu1 %v4266_v9  ;;  %3736 = vmatprep.subr.bf16.mxu0 %v4266_v9 }
 0x635   : > { %3721 = vmatmul.mubr.msk.bf16.vlgmr.msra.gmra.mrb[12].mxu1 %vm1315_vm4, %v1544_v58  ;;  %3727 = vmatmul.mubr.msk.bf16.vlgmr.msra.gmra.mrb[8].mxu0 %vm1315_vm4, %v1545_v59 }
 0x636   : > { %3731 = vmatpush3.bf16.msra.mxu1 %v1645_v50  ;;  %3737 = vmatpush3.bf16.msra.mxu0 %v1691_v51 }
 0x637   : > { %3732 = vmatprep.mubr.msk.bf16.mxu1 %vm4267_vm1, %v4266_v9  ;;  %3738 = vmatprep.mubr.msk.bf16.mxu0 %vm4267_vm1, %v4266_v9 }
 0x638   : > { %3742 = vmatprep.subr.bf16.mxu1 %v4266_v9  ;;  %3750 = vmatprep.subr.bf16.mxu0 %v4266_v9 }
 0x648   : > { %v1532_v61 = vpop.xlane.xlu0 %1531 }
 0x649   : > { %3970 = vrcp.f32 %v1532_v61 }
 0x64d   : > { %v1535_v31 = vpop.xlane.xlu1 %1534 }
 0x64e   : > { %3972 = vrcp.f32 %v1535_v31 }
 0x653   : > { %v3971_v30 = vpop.eup %3970 }
 0x654   : > { %v1542_v32 = vmul.f32 %v3971_v30, %v4810_v60 }
 0x656   : > { %v1546_v63 = vpack.c.bf16 %v1542_v32, %v1542_v32 }
 0x658   : > { %v3973_v0 = vpop.eup %3972  ;;  %3733 = vmatmul.mubr.msk.bf16.vlgmr.msra.gmra.mrb[16].mxu1 %vm1315_vm4, %v1546_v63 }
 0x659   : > { %v1543_v2 = vmul.f32 %v3973_v0, %v4814_v62  ;;  %3746 = vmatprep.mubr.msk.bf16.mxu1 %vm4267_vm1, %v4266_v9  ;;  %3743 = vmatpush3.bf16.msra.mxu1 %v3940_v28 }
 0x65a   : > { %3744 = vmatprep.subr.bf16.mxu1 %v4266_v9 }
 0x65b   : > { %v1547_v3 = vpack.c.bf16 %v1543_v2, %v1543_v2 }
 0x65d   : > { %3739 = vmatmul.mubr.msk.bf16.vlgmr.msra.gmra.mrb[12].mxu0 %vm1315_vm4, %v1547_v3  ;;  %3745 = vmatpush3.bf16.msra.mxu1 %v3941_v40 }
 0x65e   : > { %3754 = vmatprep.mubr.msk.bf16.mxu0 %vm4267_vm1, %v4266_v9  ;;  %3758 = vmatprep.subr.bf16.mxu1 %v4266_v9 }
 0x708   : > { %v1589_v4 = vpop.f32.mrb[12].mxu1  ;;  %v1635_v5 = vpop.f32.mrb[8].mxu0 }
 0x709   : > { %v3722_v6 = vpop.f32.mrb[13].mxu1  ;;  %v3728_v7 = vpop.f32.mrb[9].mxu0 }
 0x70a   : > { %v1592_v60 = vpop.f32.mrb[14].mxu1  ;;  %v1638_v8 = vpop.f32.mrb[10].mxu0 }
 0x70b   : > { %v3723_v10 = vpop.f32.mrb[15].mxu1  ;;  %v3729_v11 = vpop.f32.mrb[11].mxu0 }
 0x70c   : > { %v3942_v11 = vld [vmem:[#allocation10] sm:$0xff]  }
 0x72b   : > { %v1681_v12 = vpop.f32.mrb[16].mxu1 }
 0x72c   : > { %v1733_v13 = vcombine.low %v1589_v4, %v1681_v12  ;;  %v1734_v62 = vcombine.high %v1589_v4, %v1681_v12  ;;  %v3734_v14 = vpop.f32.mrb[17].mxu1  ;;  %v3943_v12 = vld [vmem:[#allocation10 + $0x8] sm:$0xff]  }
 0x72d   : > { %v1684_v15 = vpop.f32.mrb[18].mxu1 }
 0x72e   : > { %v3735_v16 = vpop.f32.mrb[19].mxu1  ;;  %v1741_v22 = vrot.slane %v1733_v13, %v4732_v43  ;;  %v1748_v23 = vrot.slane %v1734_v62, %v4732_v43  ;;  %v758_v13 = vld [vmem:[%s659_s16] sm:$0xf]  ;;  %s3628_s16 = sshll.u32 %s4400_s1, 7  ;;  %s3375_s1 = scalar_lea.sflag [#allocation4], %s4646_s18 }
 0x72f   : > { %s5144_s8 = scalar_lea.hbm %s5305_s24, %s3628_s16 }
 0x730   : > { %v1727_v17 = vpop.f32.mrb[12].mxu0 }
 0x731   : > { %v1749_v18 = vcombine.low %v1635_v5, %v1727_v17  ;;  %v1750_v19 = vcombine.high %v1635_v5, %v1727_v17  ;;  %v3740_v20 = vpop.f32.mrb[13].mxu0  ;;  %v3944_v17 = vld [vmem:[%s5295_s6] sm:$0xff]  }
 0x732   : > { %v1730_v21 = vpop.f32.mrb[14].mxu0  ;;  %3751 = vmatpush3.bf16.msra.mxu0 %v3944_v17 }
 0x733   : > { %v1757_v24 = vrot.slane %v1749_v18, %v4732_v43  ;;  %v1764_v25 = vrot.slane %v1750_v19, %v4732_v43  ;;  %v3741_v27 = vpop.f32.mrb[15].mxu0  ;;  %v3945_v18 = vld [vmem:[%s5295_s6 + $0x8] sm:$0xff]   ;;  %3752 = vmatprep.subr.bf16.mxu0 %v4266_v9 }
 0x735   : > { %v1765_v29 = vcombine.low %v1741_v22, %v1757_v24  ;;  %v1766_v33 = vcombine.high %v1741_v22, %v1757_v24  ;;  %v1781_v34 = vcombine.low %v1748_v23, %v1764_v25  ;;  %v1782_v35 = vcombine.high %v1748_v23, %v1764_v25 }
 0x736   : > { %3753 = vmatpush3.bf16.msra.mxu0 %v3945_v18 }
 0x737   : > { %v1773_v36 = vrot.slane %v1765_v29, %v4742_v53  ;;  %v1780_v37 = vrot.slane %v1766_v33, %v4742_v53  ;;  %v1789_v38 = vrot.slane %v1781_v34, %v4742_v53  ;;  %v1796_v39 = vrot.slane %v1782_v35, %v4742_v53  ;;  %3766 = vmatprep.subr.bf16.mxu0 %v4266_v9  ;;  %v3588_v35 = vld [vmem:[%s5296_s7] ss:$0 sm:$0xff]  ;;  %s5301_s7 = sld [smem:[#allocation40_spill]] }
 0x739   : > { %v1801_v41 = vcombine.low %v1773_v36, %v1780_v37  ;;  %v3583_v42 = vcombine.high %v1773_v36, %v1780_v37  ;;  %v1817_v44 = vcombine.low %v1789_v38, %v1796_v39  ;;  %v3584_v45 = vcombine.high %v1789_v38, %v1796_v39  ;;  %v3589_v38 = vld [vmem:[%s5297_s10] ss:$0 sm:$0xff] }
 0x73b   : > { %v1808_v46 = vrot.slane %v1801_v41, %v4732_v43  ;;  %v1816_v47 = vrot.slane %v3583_v42, %v4732_v43  ;;  %v1824_v48 = vrot.slane %v1817_v44, %v4732_v43  ;;  %v1832_v49 = vrot.slane %v3584_v45, %v4732_v43 }
 0x73d   : > { %v1834_v52 = vcombine.high %v1808_v46, %v1816_v47  ;;  %v1850_v54 = vcombine.high %v1824_v48, %v1832_v49  ;;  %v1833_v26 = vcombine.low %v1808_v46, %v1816_v47  ;;  %v1849_v55 = vcombine.low %v1824_v48, %v1832_v49 }
 0x73f   : > { %v1848_v56 = vrot.slane %v1834_v52, %v4742_v53  ;;  %v1864_v57 = vrot.slane %v1850_v54, %v4742_v53  ;;  %v1841_v58 = vrot.slane %v1833_v26, %v4742_v53  ;;  %v1857_v59 = vrot.slane %v1849_v55, %v4742_v53 }
 0x741   : > { %v1867_v50 = vcombine.low %v1848_v56, %v1864_v57  ;;  %v1866_v51 = vcombine.high %v1841_v58, %v1857_v59  ;;  %v1868_v61 = vcombine.high %v1848_v56, %v1864_v57  ;;  %v1865_v31 = vcombine.low %v1841_v58, %v1857_v59 }
 0x743   : > { %1874 = vrot.lane.b32.xlu1 %v1867_v50, %s4275_s2  ;;  %1870 = vrot.lane.b32.xlu0 %v1866_v51, %s4276_s29 }
 0x747   : > { %1878 = vrot.lane.b32.xlu0 %v1868_v61, %s4277_s25 }
 0x7b5   : > { %v1871_v30 = vpop.permute.xlu0 %1870  ;;  %v1875_v32 = vpop.permute.xlu1 %1874 }
 0x7b6   : > { %v1881_v63 = vsel %vm1315_vm4, %v1865_v31, %v1871_v30 }
 0x7b7   : > { %v1883_v2 = vsel %vm1882_vm6, %v1881_v63, %v1875_v32 }
 0x7b9   : > { %v1879_v0 = vpop.permute.xlu0 %1878 }
 0x7ba   : > { %v1885_v3 = vsel %vm1884_vm7, %v1883_v2, %v1879_v0 }
 0x7bb   : > { %v1886_v4 = vpack.c.bf16 %v1885_v3, %v1885_v3 }
 0x7bd   : > { %3747 = vmatmul.mubr.msk.bf16.vlgmr.msra.gmra.mrb[20].mxu1 %vm763_vm0, %v1886_v4 }
 0x7be   : > { %3762 = vmatprep.mubr.msk.bf16.mxu1 %vm4267_vm1, %v4266_v9  ;;  %3759 = vmatpush3.bf16.msra.mxu1 %v3942_v11 }
 0x7bf   : > { %3760 = vmatprep.subr.bf16.mxu1 %v4266_v9 }
 0x7c2   : > { %3761 = vmatpush3.bf16.msra.mxu1 %v3943_v12 }
 0x7c3   : > { %3772 = vmatprep.subr.bf16.mxu1 %v4266_v9 }
 0x7c5   : > { %3763 = vmatmul.mubr.msk.bf16.vlgmr.msra.gmra.mrb[24].mxu1 %vm763_vm0, %v758_v13 }
 0x7c6   : > { %3774 = vmatprep.mubr.msk.bf16.mxu1 %vm4267_vm1, %v4266_v9 }
 0x890   : > { %v1940_v5 = vpop.f32.mrb[20].mxu1 }
 0x891   : > { %v4892_v6 = vadd.f32 %v1940_v5, %v4677_v1  ;;  %v3748_v7 = vpop.f32.mrb[21].mxu1 }
 0x892   : > { %v1943_v60 = vpop.f32.mrb[22].mxu1 }
 0x893   : > { %v3749_v8 = vpop.f32.mrb[23].mxu1  ;;  %v1947_v10 = vsel %vm763_vm0, %v4892_v6, 0.0 }
 0x894   : > { %1948 = vadd.xlane.f32.xlu1 %v1947_v10 }
 0x898   : > { %v4913_v19 = vpop.f32.mrb[24].mxu1 }
 0x899   : > { %v3764_v20 = vpop.f32.mrb[25].mxu1 }
 0x89a   : > { %v2099_v21 = vpop.f32.mrb[26].mxu1 }
 0x89b   : > { %v3765_v22 = vpop.f32.mrb[27].mxu1 }
 0x8a5   : > { %2256 = vrot.lane.b32.xlu1 %v4913_v19, %s4270_s22 }
 0x8a9   : > { %2259 = vrot.lane.b32.xlu1 %v4913_v19, %s4268_s23 }
 0x921   : > { %v1949_v1 = vpop.xlane.xlu1 %1948 }
 0x922   : > { %v1950_v62 = vmul.f32 0.03125, %v1949_v1 }
 0x924   : > { %v1951_v14 = vsub.f32 %v4892_v6, %v1950_v62 }
 0x925   : > { %v4930_v42 = vpop.permute.xlu1 %2256 }
 0x926   : > { %v1952_v15 = vmul.f32 %v1951_v14, %v1951_v14  ;;  %v1971_v36 = vmul.f32 %v3588_v35, %v1951_v14  ;;  %v2262_v46 = vcombine.low %v4913_v19, %v4930_v42  ;;  %v2263_v47 = vcombine.high %v4913_v19, %v4930_v42 }
 0x928   : > { %v1953_v16 = vsel %vm763_vm0, %v1952_v15, 0.0  ;;  %v2270_v52 = vrot.slane %v2262_v46, %v4732_v43  ;;  %v2277_v54 = vrot.slane %v2263_v47, %v4732_v43 }
 0x929   : > { %1954 = vadd.xlane.f32.xlu0 %v1953_v16  ;;  %v4932_v44 = vpop.permute.xlu1 %2259 }
 0x93f   : > { %2253 = vrot.lane.b32.xlu0 %v4913_v19, %s4269_s19 }
 0x9b6   : > { %v1955_v23 = vpop.xlane.xlu0 %1954 }
 0x9b7   : > { %v1956_v24 = vmul.f32 0.032258064, %v1955_v23 }
 0x9b9   : > { %3974 = vrsqrt.f32 %v1956_v24  ;;  %vm1959_vm8 = vcmp.eq.f32.partialorder %v1956_v24, inf  ;;  %v1962_v28 = vand.u32 2147483648, %v1956_v24  ;;  %vm1961_vm9 = vcmp.eq.f32.partialorder %v1956_v24, 0.0 }
 0x9ba   : > { %v4934_v45 = vpop.permute.xlu0 %2253 }
 0x9bb   : > { %v2278_v48 = vcombine.low %v4934_v45, %v4932_v44  ;;  %v2279_v49 = vcombine.high %v4934_v45, %v4932_v44 }
 0x9bd   : > { %v2286_v26 = vrot.slane %v2278_v48, %v4732_v43  ;;  %v2293_v55 = vrot.slane %v2279_v49, %v4732_v43 }
 0x9bf   : > { %v2294_v56 = vcombine.low %v2270_v52, %v2286_v26  ;;  %v2295_v57 = vcombine.high %v2270_v52, %v2286_v26  ;;  %v2310_v58 = vcombine.low %v2277_v54, %v2293_v55  ;;  %v2311_v59 = vcombine.high %v2277_v54, %v2293_v55 }
 0x9c1   : > { %v2302_v50 = vrot.slane %v2294_v56, %v4742_v53  ;;  %v2309_v51 = vrot.slane %v2295_v57, %v4742_v53  ;;  %v2318_v61 = vrot.slane %v2310_v58, %v4742_v53  ;;  %v2325_v31 = vrot.slane %v2311_v59, %v4742_v53 }
 0x9c3   : > { %v3975_v25 = vpop.eup %3974  ;;  %v2330_v30 = vcombine.low %v2302_v50, %v2309_v51  ;;  %v3598_v32 = vcombine.high %v2302_v50, %v2309_v51  ;;  %v2346_v63 = vcombine.low %v2318_v61, %v2325_v31  ;;  %v3599_v0 = vcombine.high %v2318_v61, %v2325_v31 }
 0x9c4   : > { %v1958_v27 = vmul.f32 %v3975_v25, %v1956_v24 }
 0x9c5   : > { %v2337_v2 = vrot.slane %v2330_v30, %v4732_v43  ;;  %v2345_v3 = vrot.slane %v3598_v32, %v4732_v43  ;;  %v2353_v4 = vrot.slane %v2346_v63, %v4732_v43  ;;  %v2361_v5 = vrot.slane %v3599_v0, %v4732_v43 }
 0x9c6   : > { %v1960_v29 = vsel %vm1959_vm8, %v1956_v24, %v1958_v27 }
 0x9c7   : > { %v1963_v33 = vsel %vm1961_vm9, %v1962_v28, %v1960_v29  ;;  %v2362_v7 = vcombine.low %v2337_v2, %v2345_v3  ;;  %v2378_v60 = vcombine.low %v2353_v4, %v2361_v5  ;;  %v2363_v8 = vcombine.high %v2337_v2, %v2345_v3 }
 0x9c8   : > { %v1972_v34 = vadd.f32 1e-06, %v1963_v33  ;;  %v2379_v10 = vcombine.high %v2353_v4, %v2361_v5 }
 0x9c9   : > { %v2370_v11 = vrot.slane %v2362_v7, %v4742_v53  ;;  %v2386_v12 = vrot.slane %v2378_v60, %v4742_v53  ;;  %v2377_v13 = vrot.slane %v2363_v8, %v4742_v53 }
 0x9ca   : > { %3976 = vrcp.f32 %v1972_v34  ;;  %v2393_v1 = vrot.slane %v2379_v10, %v4742_v53 }
 0x9cb   : > { %v2394_v62 = vcombine.low %v2370_v11, %v2386_v12  ;;  %v2395_v14 = vcombine.high %v2370_v11, %v2386_v12 }
 0x9cc   : > { %v2396_v15 = vcombine.low %v2377_v13, %v2393_v1  ;;  %v2397_v16 = vcombine.high %v2377_v13, %v2393_v1 }
 0x9cd   : > { %v2398_v17 = vpack.c.bf16 %v2394_v62, %v2394_v62  ;;  %v2399_v18 = vpack.c.bf16 %v2395_v14, %v2395_v14 }
 0x9ce   : > { %v2400_v5 = vpack.c.bf16 %v2396_v15, %v2396_v15  ;;  %v2401_v7 = vpack.c.bf16 %v2397_v16, %v2397_v16  ;;  %v761_v16 = vld [vmem:[%s677_s11] sm:$0xf]  ;;  %s4178_s11 = sshll.u32 %s4278_s27, 4  ;;  %s4179_s11 = int_to_ptr.vmem [resolvable:$false] %s4178_s11 }
 0x9cf   : > { %v2558_v20 = vsel %vm1315_vm4, %v2398_v17, 0  ;;  %v2604_v21 = vsel %vm1315_vm4, %v2399_v18, 0  ;;  %v762_v17 = vunpack.c.l.bf16 %v761_v16 }
 0x9d0   : > { %3773 = vmatpush3.bf16.xpose.msra.mxu1 %v2604_v21  ;;  %v2650_v12 = vsel %vm1315_vm4, %v2400_v5, 0  ;;  %v2696_v13 = vsel %vm1315_vm4, %v2401_v7, 0 }
 0x9d1   : > { %3784 = vmatprep.subr.bf16.mxu1 %v4266_v9 }
 0x9d4   : > { %v3977_v37 = vpop.eup %3976 }
 0x9d5   : > { %v1974_v39 = vmul.f32 %v3977_v37, %v1971_v36 }
 0x9d7   : > { %v1982_v40 = vadd.f32 %v3589_v38, %v1974_v39 }
 0x9d9   : > { %v1983_v41 = vpack.c.bf16 %v1982_v40, %v1982_v40 }
 0x9db   : > { %3755 = vmatmul.mubr.msk.bf16.vlgmr.msra.gmra.mrb[16].mxu0 %vm763_vm0, %v1983_v41 }
 0x9dc   : > { %3768 = vmatprep.mubr.msk.bf16.mxu0 %vm4267_vm1, %v4266_v9  ;;  %3767 = vmatpush3.bf16.xpose.msra.mxu0 %v2558_v20 }
 0x9dd   : > { %3778 = vmatprep.subr.bf16.mxu0 %v4266_v9 }
 0xaae   : > { %v2037_v22 = vpop.f32.mrb[16].mxu0 }
 0xaaf   : > { %v3756_v23 = vpop.f32.mrb[17].mxu0  ;;  %2106 = vrot.lane.b32.xlu1 %v2037_v22, %s4270_s22  ;;  %2103 = vrot.lane.b32.xlu0 %v2037_v22, %s4269_s19  ;;  %s5302_s22 = sld [smem:[#allocation34_spill]]  ;;  %s4180_s19 = scalar_lea.vmem %s4179_s11, 256 }
 0xab0   : > { %v2040_v24 = vpop.f32.mrb[18].mxu0 }
 0xab1   : > { %v3757_v25 = vpop.f32.mrb[19].mxu0 }
 0xab3   : > { %2109 = vrot.lane.b32.xlu0 %v2037_v22, %s4268_s23  ;;  %s5298_s23 = sld [smem:[#allocation33_spill]] }
 0xb21   : > { %v2107_v27 = vpop.permute.xlu1 %2106  ;;  %v2104_v28 = vpop.permute.xlu0 %2103 }
 0xb22   : > { %v2112_v29 = vcombine.low %v2037_v22, %v2107_v27  ;;  %v2113_v33 = vcombine.high %v2037_v22, %v2107_v27 }
 0xb24   : > { %v2120_v37 = vrot.slane %v2112_v29, %v4732_v43  ;;  %v2127_v38 = vrot.slane %v2113_v33, %v4732_v43 }
 0xb25   : > { %v2110_v34 = vpop.permute.xlu0 %2109 }
 0xb26   : > { %v2128_v35 = vcombine.low %v2104_v28, %v2110_v34  ;;  %v2129_v36 = vcombine.high %v2104_v28, %v2110_v34 }
 0xb28   : > { %v2136_v39 = vrot.slane %v2128_v35, %v4732_v43  ;;  %v2143_v40 = vrot.slane %v2129_v36, %v4732_v43 }
 0xb2a   : > { %v2144_v41 = vcombine.low %v2120_v37, %v2136_v39  ;;  %v2145_v46 = vcombine.high %v2120_v37, %v2136_v39  ;;  %v2160_v47 = vcombine.low %v2127_v38, %v2143_v40  ;;  %v2161_v48 = vcombine.high %v2127_v38, %v2143_v40 }
 0xb2c   : > { %v2152_v49 = vrot.slane %v2144_v41, %v4742_v53  ;;  %v2159_v52 = vrot.slane %v2145_v46, %v4742_v53  ;;  %v2168_v54 = vrot.slane %v2160_v47, %v4742_v53  ;;  %v2175_v26 = vrot.slane %v2161_v48, %v4742_v53 }
 0xb2e   : > { %v2180_v55 = vcombine.low %v2152_v49, %v2159_v52  ;;  %v3596_v56 = vcombine.high %v2152_v49, %v2159_v52  ;;  %v2196_v57 = vcombine.low %v2168_v54, %v2175_v26  ;;  %v3597_v58 = vcombine.high %v2168_v54, %v2175_v26 }
 0xb30   : > { %v2187_v59 = vrot.slane %v2180_v55, %v4732_v43  ;;  %v2195_v50 = vrot.slane %v3596_v56, %v4732_v43  ;;  %v2203_v51 = vrot.slane %v2196_v57, %v4732_v43  ;;  %v2211_v61 = vrot.slane %v3597_v58, %v4732_v43 }
 0xb32   : > { %v2212_v31 = vcombine.low %v2187_v59, %v2195_v50  ;;  %v2228_v30 = vcombine.low %v2203_v51, %v2211_v61  ;;  %v2213_v32 = vcombine.high %v2187_v59, %v2195_v50  ;;  %v2229_v63 = vcombine.high %v2203_v51, %v2211_v61 }
 0xb34   : > { %v2220_v0 = vrot.slane %v2212_v31, %v4742_v53  ;;  %v2236_v2 = vrot.slane %v2228_v30, %v4742_v53  ;;  %v2227_v10 = vrot.slane %v2213_v32, %v4742_v53  ;;  %v2243_v11 = vrot.slane %v2229_v63, %v4742_v53 }
 0xb36   : > { %v2244_v3 = vcombine.low %v2220_v0, %v2236_v2  ;;  %v2245_v4 = vcombine.high %v2220_v0, %v2236_v2  ;;  %v2246_v1 = vcombine.low %v2227_v10, %v2243_v11  ;;  %v2247_v62 = vcombine.high %v2227_v10, %v2243_v11 }
 0xb38   : > { %v2248_v60 = vpack.c.bf16 %v2244_v3, %v2244_v3  ;;  %v2249_v8 = vpack.c.bf16 %v2245_v4, %v2245_v4  ;;  %v2250_v14 = vpack.c.bf16 %v2246_v1, %v2246_v1  ;;  %v2251_v15 = vpack.c.bf16 %v2247_v62, %v2247_v62 }
 0xb3a   : > { %3769 = vmatmul.mubr.msk.bf16.vlgmr.msra.gmra.mrb[20].mxu0 %vm1315_vm4, %v2248_v60  ;;  %3775 = vmatmul.mubr.msk.bf16.vlgmr.msra.gmra.mrb[28].mxu1 %vm1315_vm4, %v2249_v8 }
 0xb3b   : > { %3779 = vmatpush3.bf16.xpose.msra.mxu0 %v2650_v12  ;;  %3785 = vmatpush3.bf16.xpose.msra.mxu1 %v2696_v13 }
 0xb3c   : > { %3780 = vmatprep.mubr.msk.bf16.mxu0 %vm4267_vm1, %v4266_v9  ;;  %3786 = vmatprep.mubr.msk.bf16.mxu1 %vm4267_vm1, %v4266_v9 }
 0xb3d   : > { %3790 = vmatprep.subr.bf16.mxu0 %v4266_v9  ;;  %3796 = vmatprep.subr.bf16.mxu1 %v4266_v9 }
 0xb42   : > { %3781 = vmatmul.mubr.msk.bf16.vlgmr.msra.gmra.mrb[24].mxu0 %vm1315_vm4, %v2250_v14  ;;  %3787 = vmatmul.mubr.msk.bf16.vlgmr.msra.gmra.mrb[32].mxu1 %vm1315_vm4, %v2251_v15 }
 0xb43   : > { %3792 = vmatprep.mubr.msk.bf16.mxu0 %vm4267_vm1, %v4266_v9  ;;  %3798 = vmatprep.mubr.msk.bf16.mxu1 %vm4267_vm1, %v4266_v9 }
 0xc0d   : > { %v2594_v18 = vpop.f32.mrb[20].mxu0  ;;  %v2640_v20 = vpop.f32.mrb[28].mxu1 }
 0xc0e   : > { %v2595_v21 = vadd.f32 %v2594_v18, %v762_v17  ;;  %v2641_v22 = vadd.f32 %v2640_v20, %v762_v17  ;;  %v3770_v23 = vpop.f32.mrb[21].mxu0  ;;  %v3776_v24 = vpop.f32.mrb[29].mxu1 }
 0xc0f   : > { %v2597_v25 = vpop.f32.mrb[22].mxu0  ;;  %v2643_v27 = vpop.f32.mrb[30].mxu1 }
 0xc10   : > { %v3771_v28 = vpop.f32.mrb[23].mxu0  ;;  %v3777_v29 = vpop.f32.mrb[31].mxu1  ;;  %v2738_v33 = vsel %vm1315_vm4, %v2595_v21, -inf  ;;  %v2741_v34 = vsel %vm1315_vm4, %v2641_v22, -inf }
 0xc11   : > { %2739 = vmax.xlane.f32.xlu1 %v2738_v33  ;;  %2742 = vmax.xlane.f32.xlu0 %v2741_v34 }
 0xc15   : > { %v2686_v35 = vpop.f32.mrb[24].mxu0  ;;  %v2732_v36 = vpop.f32.mrb[32].mxu1 }
 0xc16   : > { %v2687_v37 = vadd.f32 %v2686_v35, %v762_v17  ;;  %v2733_v38 = vadd.f32 %v2732_v36, %v762_v17  ;;  %v3782_v39 = vpop.f32.mrb[25].mxu0  ;;  %v3788_v40 = vpop.f32.mrb[33].mxu1 }
 0xc17   : > { %v2689_v41 = vpop.f32.mrb[26].mxu0  ;;  %v2735_v46 = vpop.f32.mrb[34].mxu1 }
 0xc18   : > { %v3783_v47 = vpop.f32.mrb[27].mxu0  ;;  %v3789_v48 = vpop.f32.mrb[35].mxu1  ;;  %v2744_v49 = vsel %vm1315_vm4, %v2687_v37, -inf  ;;  %v2747_v52 = vsel %vm1315_vm4, %v2733_v38, -inf }
 0xc19   : > { %2745 = vmax.xlane.f32.xlu0 %v2744_v49  ;;  %2748 = vmax.xlane.f32.xlu1 %v2747_v52 }
 0xc2a   : > { %2404 = vrot.lane.b32.xlu1 %v4934_v45, %s4271_s17 }
 0xc2f   : > { %2402 = vrot.lane.b32.xlu0 %v4913_v19, %s4271_s17 }
 0xc9e   : > { %v2740_v54 = vpop.xlane.xlu1 %2739  ;;  %v2743_v26 = vpop.xlane.xlu0 %2742 }
 0xc9f   : > { %v2750_v55 = vsub.f32 %v2595_v21, %v2740_v54  ;;  %v2751_v56 = vsub.f32 %v2641_v22, %v2743_v26 }
 0xca1   : > { %v2754_v57 = vmul.f32 1.442695, %v2750_v55  ;;  %v2756_v58 = vmul.f32 1.442695, %v2751_v56 }
 0xca3   : > { %3978 = vpow2.f32 %v2754_v57 }
 0xca4   : > { %3980 = vpow2.f32 %v2756_v58 }
 0xca6   : > { %v2749_v19 = vpop.xlane.xlu1 %2748  ;;  %v2746_v61 = vpop.xlane.xlu0 %2745 }
 0xca7   : > { %v2753_v31 = vsub.f32 %v2733_v38, %v2749_v19  ;;  %v2752_v30 = vsub.f32 %v2687_v37, %v2746_v61 }
 0xca9   : > { %v2760_v32 = vmul.f32 1.442695, %v2753_v31  ;;  %v2758_v63 = vmul.f32 1.442695, %v2752_v30 }
 0xcaa   : > { %v2405_v4 = vpop.permute.xlu1 %2404 }
 0xcab   : > { %3982 = vpow2.f32 %v2760_v32 }
 0xcac   : > { %3984 = vpow2.f32 %v2758_v63 }
 0xcad   : > { %v5009_v59 = vpop.eup %3978 }
 0xcae   : > { %v5011_v50 = vpop.eup %3980  ;;  %v2762_v51 = vsel %vm1315_vm4, %v5009_v59, 0.0 }
 0xcaf   : > { %2763 = vadd.xlane.f32.xlu0 %v2762_v51  ;;  %v2765_v45 = vsel %vm1315_vm4, %v5011_v50, 0.0 }
 0xcb0   : > { %2766 = vadd.xlane.f32.xlu1 %v2765_v45 }
 0xcb5   : > { %v5021_v0 = vpop.eup %3982 }
 0xcb6   : > { %v5023_v2 = vpop.eup %3984  ;;  %v2771_v3 = vsel %vm1315_vm4, %v5021_v0, 0.0 }
 0xcc1   : > { %2406 = vrot.lane.b32.xlu1 %v4930_v42, %s4271_s17  ;;  %v2768_v42 = vsel %vm1315_vm4, %v5023_v2, 0.0 }
 0xcc5   : > { %2408 = vrot.lane.b32.xlu0 %v4932_v44, %s4271_s17  ;;  %v2403_v44 = vpop.permute.xlu0 %2402  ;;  %s3563_s17 = sshll.u32 %s4646_s18, 3 }
 0xce4   : > { %2772 = vadd.xlane.f32.xlu0 %v2771_v3 }
 0xce5   : > { %2769 = vadd.xlane.f32.xlu1 %v2768_v42 }
 0xd3c   : > { %v2764_v5 = vpop.xlane.xlu0 %2763 }
 0xd3d   : > { %v2767_v7 = vpop.xlane.xlu1 %2766  ;;  %3986 = vrcp.f32 %v2764_v5 }
 0xd3e   : > { %3988 = vrcp.f32 %v2767_v7 }
 0xd40   : > { %v2409_v60 = vpop.permute.xlu0 %2408 }
 0xd41   : > { %v2430_v8 = vcombine.low %v2405_v4, %v2409_v60  ;;  %v2431_v10 = vcombine.high %v2405_v4, %v2409_v60  ;;  %v2407_v11 = vpop.permute.xlu1 %2406 }
 0xd42   : > { %v2414_v12 = vcombine.low %v2403_v44, %v2407_v11  ;;  %v2415_v13 = vcombine.high %v2403_v44, %v2407_v11 }
 0xd43   : > { %v2438_v1 = vrot.slane %v2430_v8, %v4732_v43  ;;  %v2445_v62 = vrot.slane %v2431_v10, %v4732_v43 }
 0xd44   : > { %v2422_v14 = vrot.slane %v2414_v12, %v4732_v43  ;;  %v2429_v15 = vrot.slane %v2415_v13, %v4732_v43 }
 0xd46   : > { %v2446_v16 = vcombine.low %v2422_v14, %v2438_v1  ;;  %v2447_v17 = vcombine.high %v2422_v14, %v2438_v1  ;;  %v2462_v18 = vcombine.low %v2429_v15, %v2445_v62  ;;  %v2463_v20 = vcombine.high %v2429_v15, %v2445_v62 }
 0xd47   : > { %v3987_v47 = vpop.eup %3986 }
 0xd48   : > { %v2454_v21 = vrot.slane %v2446_v16, %v4742_v53  ;;  %v2461_v22 = vrot.slane %v2447_v17, %v4742_v53  ;;  %v2470_v23 = vrot.slane %v2462_v18, %v4742_v53  ;;  %v2477_v24 = vrot.slane %v2463_v20, %v4742_v53  ;;  %v3989_v52 = vpop.eup %3988 }
 0xd49   : > { %v2778_v57 = vmul.f32 %v3987_v47, %v5009_v59  ;;  %v2779_v58 = vmul.f32 %v3989_v52, %v5011_v50 }
 0xd4a   : > { %v2482_v25 = vcombine.low %v2454_v21, %v2461_v22  ;;  %v3600_v27 = vcombine.high %v2454_v21, %v2461_v22  ;;  %v2498_v28 = vcombine.low %v2470_v23, %v2477_v24  ;;  %v3601_v29 = vcombine.high %v2470_v23, %v2477_v24 }
 0xd4b   : > { %v2782_v32 = vpack.c.bf16 %v2778_v57, %v2778_v57  ;;  %v2783_v63 = vpack.c.bf16 %v2779_v58, %v2779_v58 }
 0xd4c   : > { %v2489_v33 = vrot.slane %v2482_v25, %v4732_v43  ;;  %v2497_v34 = vrot.slane %v3600_v27, %v4732_v43  ;;  %v2505_v35 = vrot.slane %v2498_v28, %v4732_v43  ;;  %v2513_v36 = vrot.slane %v3601_v29, %v4732_v43 }
 0xd4e   : > { %v2514_v37 = vcombine.low %v2489_v33, %v2497_v34  ;;  %v2515_v38 = vcombine.high %v2489_v33, %v2497_v34  ;;  %v2530_v39 = vcombine.low %v2505_v35, %v2513_v36  ;;  %v2531_v40 = vcombine.high %v2505_v35, %v2513_v36 }
 0xd50   : > { %v2522_v41 = vrot.slane %v2514_v37, %v4742_v53  ;;  %v2529_v46 = vrot.slane %v2515_v38, %v4742_v53  ;;  %v2538_v48 = vrot.slane %v2530_v39, %v4742_v53  ;;  %v2545_v49 = vrot.slane %v2531_v40, %v4742_v53  ;;  %v3946_v39 = vld [vmem:[#allocation11] sm:$0xff]  }
 0xd52   : > { %v2546_v54 = vcombine.low %v2522_v41, %v2538_v48  ;;  %v2547_v26 = vcombine.high %v2522_v41, %v2538_v48  ;;  %v2548_v55 = vcombine.low %v2529_v46, %v2545_v49  ;;  %v2549_v56 = vcombine.high %v2529_v46, %v2545_v49 }
 0xd54   : > { %v2550_v51 = vpack.c.bf16 %v2546_v54, %v2546_v54  ;;  %v2551_v45 = vpack.c.bf16 %v2547_v26, %v2547_v26  ;;  %v2552_v31 = vpack.c.bf16 %v2548_v55, %v2548_v55  ;;  %v2553_v30 = vpack.c.bf16 %v2549_v56, %v2549_v56  ;;  %v3947_v26 = vld [vmem:[#allocation11 + $0x8] sm:$0xff]  }
 0xd56   : > { %v2790_v19 = vsel %vm1551_vm5, %v2550_v51, 0  ;;  %v2836_v61 = vsel %vm1551_vm5, %v2551_v45, 0  ;;  %v2882_v59 = vsel %vm1551_vm5, %v2552_v31, 0  ;;  %v2928_v50 = vsel %vm1551_vm5, %v2553_v30, 0 }
 0xd57   : > { %3791 = vmatpush3.bf16.msra.mxu0 %v2790_v19  ;;  %3797 = vmatpush3.bf16.msra.mxu1 %v2836_v61 }
 0xd58   : > { %3802 = vmatprep.subr.bf16.mxu0 %v4266_v9  ;;  %3808 = vmatprep.subr.bf16.mxu1 %v4266_v9 }
 0xd5a   : > { %3793 = vmatmul.mubr.msk.bf16.vlgmr.msra.gmra.mrb[28].mxu0 %vm1315_vm4, %v2782_v32  ;;  %3799 = vmatmul.mubr.msk.bf16.vlgmr.msra.gmra.mrb[36].mxu1 %vm1315_vm4, %v2783_v63 }
 0xd5b   : > { %3803 = vmatpush3.bf16.msra.mxu0 %v2882_v59  ;;  %3809 = vmatpush3.bf16.msra.mxu1 %v2928_v50 }
 0xd5c   : > { %3804 = vmatprep.mubr.msk.bf16.mxu0 %vm4267_vm1, %v4266_v9  ;;  %3810 = vmatprep.mubr.msk.bf16.mxu1 %vm4267_vm1, %v4266_v9 }
 0xd5d   : > { %3814 = vmatprep.subr.bf16.mxu0 %v4266_v9  ;;  %3822 = vmatprep.subr.bf16.mxu1 %v4266_v9 }
 0xd71   : > { %v2773_v3 = vpop.xlane.xlu0 %2772 }
 0xd72   : > { %3990 = vrcp.f32 %v2773_v3  ;;  %v2770_v42 = vpop.xlane.xlu1 %2769 }
 0xd73   : > { %3992 = vrcp.f32 %v2770_v42 }
 0xd7c   : > { %v3991_v44 = vpop.eup %3990 }
 0xd7d   : > { %v3993_v4 = vpop.eup %3992  ;;  %v2781_v5 = vmul.f32 %v3991_v44, %v5021_v0 }
 0xd7e   : > { %v2780_v7 = vmul.f32 %v3993_v4, %v5023_v2 }
 0xd7f   : > { %v2785_v60 = vpack.c.bf16 %v2781_v5, %v2781_v5 }
 0xd80   : > { %v2784_v8 = vpack.c.bf16 %v2780_v7, %v2780_v7 }
 0xd81   : > { %3811 = vmatmul.mubr.msk.bf16.vlgmr.msra.gmra.mrb[40].mxu1 %vm1315_vm4, %v2785_v60 }
 0xd82   : > { %3805 = vmatmul.mubr.msk.bf16.vlgmr.msra.gmra.mrb[32].mxu0 %vm1315_vm4, %v2784_v8  ;;  %3826 = vmatprep.mubr.msk.bf16.mxu1 %vm4267_vm1, %v4266_v9 }
 0xd83   : > { %3818 = vmatprep.mubr.msk.bf16.mxu0 %vm4267_vm1, %v4266_v9  ;;  %3815 = vmatpush3.bf16.msra.mxu0 %v3946_v39 }
 0xd84   : > { %3816 = vmatprep.subr.bf16.mxu0 %v4266_v9 }
 0xd87   : > { %3817 = vmatpush3.bf16.msra.mxu0 %v3947_v26 }
 0xd88   : > { %3830 = vmatprep.subr.bf16.mxu0 %v4266_v9 }
 0xe2d   : > { %v2826_v10 = vpop.f32.mrb[28].mxu0  ;;  %v2872_v11 = vpop.f32.mrb[36].mxu1 }
 0xe2e   : > { %v3794_v12 = vpop.f32.mrb[29].mxu0  ;;  %v3800_v13 = vpop.f32.mrb[37].mxu1 }
 0xe2f   : > { %v2829_v1 = vpop.f32.mrb[30].mxu0  ;;  %v2875_v0 = vpop.f32.mrb[38].mxu1 }
 0xe30   : > { %v3795_v62 = vpop.f32.mrb[31].mxu0  ;;  %v3801_v2 = vpop.f32.mrb[39].mxu1 }
 0xe54   : > { %v2964_v14 = vpop.f32.mrb[40].mxu1 }
 0xe55   : > { %v2918_v15 = vpop.f32.mrb[32].mxu0  ;;  %v2986_v16 = vcombine.low %v2872_v11, %v2964_v14  ;;  %v2987_v17 = vcombine.high %v2872_v11, %v2964_v14  ;;  %v3812_v18 = vpop.f32.mrb[41].mxu1 }
 0xe56   : > { %v2970_v20 = vcombine.low %v2826_v10, %v2918_v15  ;;  %v2971_v21 = vcombine.high %v2826_v10, %v2918_v15  ;;  %v3806_v22 = vpop.f32.mrb[33].mxu0  ;;  %v2967_v23 = vpop.f32.mrb[42].mxu1 }
 0xe57   : > { %v2994_v24 = vrot.slane %v2986_v16, %v4732_v43  ;;  %v3001_v25 = vrot.slane %v2987_v17, %v4732_v43  ;;  %v2921_v27 = vpop.f32.mrb[34].mxu0  ;;  %v3813_v28 = vpop.f32.mrb[43].mxu1  ;;  %v3949_v16 = vld [vmem:[%s5298_s23 + $0x8] sm:$0xff]  }
 0xe58   : > { %v2978_v29 = vrot.slane %v2970_v20, %v4732_v43  ;;  %v2985_v33 = vrot.slane %v2971_v21, %v4732_v43  ;;  %v3807_v34 = vpop.f32.mrb[35].mxu0 }
 0xe5a   : > { %v3002_v35 = vcombine.low %v2978_v29, %v2994_v24  ;;  %v3003_v36 = vcombine.high %v2978_v29, %v2994_v24  ;;  %v3018_v37 = vcombine.low %v2985_v33, %v3001_v25  ;;  %v3019_v38 = vcombine.high %v2985_v33, %v3001_v25  ;;  %v3615_v29 = vld [vmem:[%s5300_s26] ss:$0 sm:$0xff]  ;;  %s754_s26 = scalar_lea.vmem [#allocation13], %s3563_s17 }
 0xe5b   : > { %s3388_s9 = sshll.u32 %s754_s26, 4  ;;  %s5146_s9 = int_to_ptr.vmem [resolvable:$true] %s3388_s9 }
 0xe5c   : > { %v3010_v40 = vrot.slane %v3002_v35, %v4742_v53  ;;  %v3017_v41 = vrot.slane %v3003_v36, %v4742_v53  ;;  %v3026_v46 = vrot.slane %v3018_v37, %v4742_v53  ;;  %v3033_v47 = vrot.slane %v3019_v38, %v4742_v53  ;;  %v3616_v35 = vld [vmem:[%s5301_s7] ss:$0 sm:$0xff]  ;;  %s4174_s10 = scalar_lea.vmem %s5146_s9, 128  ;;  %p4181_p13 = scmp.lt.s32.totalorder %s5146_s9, %s4179_s11 }
 0xe5d   : > { %p4175_p8 = scmp.ne.s32.totalorder %s5146_s9, %s4174_s10  ;;  %p4182_p3 = scmp.lt.s32.totalorder %s4180_s19, %s4174_s10 }
 0xe5e   : > { %v3038_v48 = vcombine.low %v3010_v40, %v3017_v41  ;;  %v3610_v49 = vcombine.high %v3010_v40, %v3017_v41  ;;  %v3054_v52 = vcombine.low %v3026_v46, %v3033_v47  ;;  %v3611_v54 = vcombine.high %v3026_v46, %v3033_v47  ;;  %v3617_v41 = vld [vmem:[%s5302_s22] ss:$0 sm:$0xff] }
 0xe5f   : > { %p4176_p2 = pnand %p4175_p8, %p5306_p7  ;;  %p4183_p6 = por %p4182_p3, %p4181_p13 }
 0xe60   : > { %v3045_v55 = vrot.slane %v3038_v48, %v4732_v43  ;;  %v3053_v56 = vrot.slane %v3610_v49, %v4732_v43  ;;  %v3061_v57 = vrot.slane %v3054_v52, %v4732_v43  ;;  %v3069_v58 = vrot.slane %v3611_v54, %v4732_v43 }
 0xe61   : > { %p4177_p5 = pneg %p4176_p2 }
 0xe62   : > { %v3071_v51 = vcombine.high %v3045_v55, %v3053_v56  ;;  %v3087_v45 = vcombine.high %v3061_v57, %v3069_v58  ;;  %v3070_v19 = vcombine.low %v3045_v55, %v3053_v56  ;;  %v3086_v61 = vcombine.low %v3061_v57, %v3069_v58  ;;  %v3626_v56 = vld [vmem:[%s5303_s28] ss:$0 sm:$0xff] }
 0xe63   : > { %p4184_p10 = pnand %p4183_p6, %p4177_p5 }
 0xe64   : > { %v3085_v31 = vrot.slane %v3071_v51, %v4742_v53  ;;  %v3101_v30 = vrot.slane %v3087_v45, %v4742_v53  ;;  %v3078_v32 = vrot.slane %v3070_v19, %v4742_v53  ;;  %v3094_v63 = vrot.slane %v3086_v61, %v4742_v53 }
 0xe66   : > { %v3104_v59 = vcombine.low %v3085_v31, %v3101_v30  ;;  %v3103_v50 = vcombine.high %v3078_v32, %v3094_v63  ;;  %v3105_v3 = vcombine.high %v3085_v31, %v3101_v30  ;;  %v3102_v42 = vcombine.low %v3078_v32, %v3094_v63 }
 0xe68   : > { %3111 = vrot.lane.b32.xlu1 %v3104_v59, %s4275_s2  ;;  %3107 = vrot.lane.b32.xlu0 %v3103_v50, %s4276_s29  ;;  %s5299_s29 = sld [smem:[#allocation35_spill]] }
 0xe6c   : > { %3115 = vrot.lane.b32.xlu1 %v3105_v3, %s4277_s25 }
 0xe6e   : > { %v3950_v17 = vld [vmem:[%s5299_s29] sm:$0xff]   ;;  %v3951_v18 = vld [vmem:[%s5299_s29 + $0x8] sm:$0xff]   ;;  %v3952_v39 = vld [vmem:[%s5299_s29 + $0x10] sm:$0xff]  }
 0xe6f   : > { %v3953_v40 = vld [vmem:[%s5299_s29 + $0x18] sm:$0xff]  }
 0xeda   : > { %v3112_v43 = vpop.permute.xlu1 %3111  ;;  %v3108_v44 = vpop.permute.xlu0 %3107 }
 0xedb   : > { %v3118_v4 = vsel %vm1315_vm4, %v3102_v42, %v3108_v44 }
 0xedc   : > { %v3119_v7 = vsel %vm1882_vm6, %v3118_v4, %v3112_v43 }
 0xede   : > { %v3116_v5 = vpop.permute.xlu1 %3115 }
 0xedf   : > { %v3120_v60 = vsel %vm1884_vm7, %v3119_v7, %v3116_v5 }
 0xee0   : > { %v3121_v53 = vpack.c.bf16 %v3120_v60, %v3120_v60 }
 0xee2   : > { %3819 = vmatmul.mubr.msk.bf16.vlgmr.msra.gmra.mrb[36].mxu0 %vm763_vm0, %v3121_v53 }
 0xee3   : > { %3838 = vmatprep.mubr.msk.bf16.mxu0 %vm4267_vm1, %v4266_v9  ;;  %3831 = vmatpush3.bf16.msra.mxu0 %v3950_v17 }
 0xee4   : > { %3832 = vmatprep.subr.bf16.mxu0 %v4266_v9 }
 0xee7   : > { %3833 = vmatpush3.bf16.msra.mxu0 %v3951_v18 }
 0xee8   : > { %3834 = vmatprep.subr.bf16.mxu0 %v4266_v9 }
 0xeeb   : > { %3835 = vmatpush3.bf16.msra.mxu0 %v3952_v39 }
 0xeec   : > { %3836 = vmatprep.subr.bf16.mxu0 %v4266_v9 }
 0xeef   : > { %3837 = vmatpush3.bf16.msra.mxu0 %v3953_v40 }
 0xfb5   : > { %v3175_v8 = vpop.f32.mrb[36].mxu0 }
 0xfb6   : > { %v5097_v10 = vadd.f32 %v3175_v8, %v4892_v6  ;;  %v3820_v11 = vpop.f32.mrb[37].mxu0  ;;  %v3948_v6 = vld [vmem:[%s5298_s23] sm:$0xff]  }
 0xfb7   : > { %v3178_v12 = vpop.f32.mrb[38].mxu0  ;;  %3823 = vmatpush3.bf16.msra.mxu1 %v3948_v6 }
 0xfb8   : > { %v3821_v13 = vpop.f32.mrb[39].mxu0  ;;  %v3182_v1 = vsel %vm763_vm0, %v5097_v10, 0.0  ;;  %3824 = vmatprep.subr.bf16.mxu1 %v4266_v9 }
 0xfb9   : > { %3183 = vadd.xlane.f32.xlu0 %v3182_v1 }
 0xfbb   : > { %3825 = vmatpush3.bf16.msra.mxu1 %v3949_v16 }
0x1046   : > { %v3184_v0 = vpop.xlane.xlu0 %3183 }
0x1047   : > { %v3185_v62 = vmul.f32 0.03125, %v3184_v0 }
0x1049   : > { %v3186_v2 = vsub.f32 %v5097_v10, %v3185_v62 }
0x104b   : > { %v3187_v14 = vmul.f32 %v3186_v2, %v3186_v2  ;;  %v3206_v33 = vmul.f32 %v3615_v29, %v3186_v2 }
0x104d   : > { %v3188_v15 = vsel %vm763_vm0, %v3187_v14, 0.0 }
0x104e   : > { %3189 = vadd.xlane.f32.xlu1 %v3188_v15 }
0x10db   : > { %v3190_v20 = vpop.xlane.xlu1 %3189 }
0x10dc   : > { %v3191_v21 = vmul.f32 0.032258064, %v3190_v20 }
0x10de   : > { %3994 = vrsqrt.f32 %v3191_v21  ;;  %vm3194_vm10 = vcmp.eq.f32.partialorder %v3191_v21, inf  ;;  %v3197_v24 = vand.u32 2147483648, %v3191_v21  ;;  %vm3196_vm11 = vcmp.eq.f32.partialorder %v3191_v21, 0.0 }
0x10e8   : > { %v3995_v22 = vpop.eup %3994 }
0x10e9   : > { %v3193_v23 = vmul.f32 %v3995_v22, %v3191_v21 }
0x10eb   : > { %v3195_v25 = vsel %vm3194_vm10, %v3191_v21, %v3193_v23 }
0x10ec   : > { %v3198_v27 = vsel %vm3196_vm11, %v3197_v24, %v3195_v25 }
0x10ed   : > { %v3207_v28 = vadd.f32 1e-06, %v3198_v27 }
0x10ef   : > { %3996 = vrcp.f32 %v3207_v28 }
0x10f9   : > { %v3997_v34 = vpop.eup %3996 }
0x10fa   : > { %v3209_v36 = vmul.f32 %v3997_v34, %v3206_v33 }
0x10fc   : > { %v3217_v37 = vadd.f32 %v3616_v35, %v3209_v36 }
0x10fe   : > { %v3218_v38 = vpack.c.bf16 %v3217_v37, %v3217_v37 }
0x1100   : > { %3827 = vmatmul.mubr.msk.bf16.vlgmr.msra.gmra.mrb[44].mxu1 %vm763_vm0, %v3218_v38 }
0x11d3   : > { %v3279_v46 = vpop.f32.mrb[44].mxu1 }
0x11d4   : > { %v3280_v47 = vadd.f32 %v3617_v41, %v3279_v46  ;;  %v3828_v48 = vpop.f32.mrb[45].mxu1 }
0x11d5   : > { %v3282_v49 = vpop.f32.mrb[46].mxu1 }
0x11d6   : > { %v3285_v52 = vmax.f32 %v3280_v47, 0.0  ;;  %v3829_v54 = vpop.f32.mrb[47].mxu1 }
0x11d8   : > { %v3286_v26 = vmin.f32 %v3285_v52, 100.0 }
0x11da   : > { %v3287_v55 = vpack.c.bf16 %v3286_v26, %v3286_v26 }
0x11dc   : > { %3839 = vmatmul.mubr.msk.bf16.vlgmr.msra.gmra.mrb[40].mxu0 %vm3320_vm12, %v3287_v55 }
0x12af   : > { %v3358_v9 = vpop.f32.mrb[40].mxu0 }
0x12b0   : > { %v3364_v57 = vadd.f32 %v3358_v9, %v5097_v10  ;;  %v3840_v58 = vpop.f32.mrb[41].mxu0 }
0x12b1   : > { %v3361_v51 = vpop.f32.mrb[42].mxu0 }
0x12b2   : > { %v3372_v45 = vadd.f32 %v3626_v56, %v3364_v57  ;;  %v3841_v19 = vpop.f32.mrb[43].mxu0 }
0x12b4   : > { %3373 = vst.msk [vmem:[%s754_s26] sm:$0xff] %vm763_vm0, %v3372_v45 }
0x12b5   : > { %4187 = shalt.err (!%p4184_p10)
}
0x12b6   : > { %s4188_s18 = scalar_lea.hbm %s5144_s8, 128  ;;  %s4192_s2 = scalar_lea.hbm %s5305_s24, 256 }
0x12b7   : > { %p4189_p1 = scmp.ne.s32.totalorder %s5144_s8, %s4188_s18  ;;  %p4193_p4 = scmp.lt.u32.totalorder %s5144_s8, %s5305_s24 }
0x12b8   : > { %p4194_p9 = scmp.lt.u32.totalorder %s4192_s2, %s4188_s18  ;;  %p4196_p8 = scmp.lt.u32.totalorder %s4188_s18, %s5144_s8 }
0x12b9   : > { %p4190_p0 = pnand %p4189_p1, %p5306_p7 }
0x12ba   : > { %p4195_p11 = por %p4194_p9, %p4193_p4 }
0x12bb   : > { %p4191_p12 = pneg %p4190_p0 }
0x12bc   : > { %p4197_p2 = por %p4196_p8, %p4195_p11 }
0x12be   : > { %p4198_p5 = pnand %p4197_p2, %p4191_p12 }
0x12c0   : > { %4201 = shalt.err (!%p4198_p5)
}
0x12c1   : > { %3858 = dma.vmem_to_hbm [thread:$0]  (%p5306_p7), %s5146_s9, 128, %s5144_s8, %s3375_s1  }
0x12c2 PF: > { %s5307_s16 = sld [smem:[#allocation20_spill]]  ;;  %s5308_s26 = sld [smem:[#allocation21_spill]] }
0x12c3   : > { %p5310_p3 = scmp.ge.s32.totalorder %s4256_s21, 2 }
0x12c8   : > { %s3400_s0 = sand.u32 1, %s5307_s16   ;;  %p5309_p13 = scmp.ne.s32.totalorder %s5308_s26, 0 }
0x12c9   : > { %s3401_s7 = scalar_lea.sflag [#allocation4], %s3400_s0 }
0x12ca   : > { %p3881_p6 = pnand %p5310_p3, %p5309_p13 }
0x12cc   : > { %4239 = dma.done.wait (!%p3881_p6), %s3401_s7, 128  }
0x12cd   : > { %4241 = vsyncadd (!%p3881_p6), %s3401_s7, 4294967168  ;;  %s5311_s21 = sld [smem:[#allocation22_spill]]  ;;  %s5312_s10 = sld [smem:[#allocation23_spill]] }
0x12ce   : > { %s5313_s0 = smov %s4248_s30  ;;  %s5314_s30 = smov %s4252_s20 }
0x12d3   : > { %p39_p10 = scmp.ge.s32.totalorder %s5311_s21, 4   ;;  %s5315_s20 = smov %s5312_s10 }
0x12d5   :  { %41 = sbr.rel (!%p39_p10) target bundleno = 28 (0x1c), region = 186 }
0x12dc   :  { %3406 = vsyncpa [#allocation3], 1 }
0x12dd   :  { %3408 = vsyncpa [#allocation3 + $0x1], 1 }
0x12de   :  { %3409 = vsyncpa [#allocation6], 1 }
0x12df   :  { %3411 = vsyncpa [#allocation6 + $0x1], 1 }
0x12e0   :  { %3412 = vsyncpa [#allocation9], 1 }
0x12e1   :  { %3414 = vsyncpa [#allocation9 + $0x1], 1 }
0x12e2   :  { %3415 = vsyncpa [#allocation12], 1 }
0x12e3   :  { %3416 = vsyncpa [#allocation4], 1 }
0x12e4   :  { %3418 = vsyncpa [#allocation4 + $0x1], 1 }

</bundles_post_ra>
